<compile_context>
chip_gen: v5e
topology: v5e:2x2
jax: 0.10.0
libtpu: 0.0.40
codegen_flags: <defaults>
</compile_context>

<pallas_src>
import functools

import jax
import jax.numpy as jnp
import numpy as np
from jax.experimental import pallas as pl
from jax.experimental.pallas import tpu as pltpu

ALPHA = 0.01  # nn.LeakyReLU default negative_slope


def _leaky(x):
    return jnp.where(x >= 0, x, ALPHA * x)


def _round_up(x, m):
    return (x + m - 1) // m * m


# ------------------------------ fused kernel ---------------------------------

def _tcn_fused_kernel(x_ref, w1_ref, b1_ref, w2_ref, b2_ref, wd_ref, bd_ref,
                      o_ref, act_ref, h1_ref, *, levels, k, T, Hp, c_in, c_out,
                      maxpad, has_down, tch):
    """Whole TemporalConvNet forward for one batch element, channels-first.

    x_ref : (1, c_in, T)        bf16  input, PyTorch NCL layout
    w1_ref: (levels, k, Hp, Hp) bf16  conv1 weights, [level][tap][out_ch][in_ch]
    b1_ref: (levels, Hp, 1)     f32   conv1 bias
    w2_ref: (levels, k, Hp, Hp) bf16  conv2 weights
    b2_ref: (levels, Hp, 1)     f32   conv2 bias
    wd_ref: (Hp, Hp)            bf16  block-0 1x1 downsample weight
    bd_ref: (Hp, 1)             f32   downsample bias
    o_ref : (1, c_out, T)       bf16  output of the last block (NCL layout)
    act_ref, h1_ref: VMEM (Hp, maxpad+T) f32 ping-pong scratches; the first
      `maxpad` columns stay zero and provide the causal left padding for every
      dilation (Conv1d zero-pads, so this is exact).
    """
    f32 = jnp.float32

    # Zero the causal-padding columns once (activations live at [:, maxpad:]).
    if maxpad > 0:
        zpad = jnp.zeros((Hp, maxpad), f32)
        act_ref[:, pl.ds(0, maxpad)] = zpad
        h1_ref[:, pl.ds(0, maxpad)] = zpad

    # Channel-pad the input up to Hp in-register and park it in `act`
    # (in-kernel replacement for the old wrapper-side transpose + jnp.pad).
    x0 = x_ref[0].astype(f32)                              # (c_in, T)
    if c_in < Hp:
        x0 = jnp.concatenate([x0, jnp.zeros((Hp - c_in, T), f32)], axis=0)
    act_ref[:, pl.ds(maxpad, T)] = x0

    n_chunks = (T + tch - 1) // tch

    def conv_chunk(src_ref, w_ref, lvl, b, pad, dil, t0, tc):
        # out[:, t] = b + sum_j W_j @ src[:, t + j*dil - pad]   (causal conv)
        acc = None
        for j in range(k):
            tap = src_ref[:, pl.ds(maxpad - pad + j * dil + t0, tc)]
            part = jnp.dot(w_ref[lvl, j], tap.astype(jnp.bfloat16),
                           preferred_element_type=f32)
            acc = part if acc is None else acc + part
        return acc + b                                     # (Hp, tc) f32

    for i in range(levels):                                # levels small: static unroll
        dil = 2 ** i
        pad = (k - 1) * dil
        b1 = b1_ref[i]                                     # (Hp, 1)
        b2 = b2_ref[i]

        # conv1 -> chomp -> LeakyReLU   (dropout1 = identity in eval mode)
        for c in range(n_chunks):
            t0 = c * tch
            tc = min(tch, T - t0)
            h1 = _leaky(conv_chunk(act_ref, w1_ref, i, b1, pad, dil, t0, tc))
            h1_ref[:, pl.ds(maxpad + t0, tc)] = h1

        # conv2 -> chomp -> LeakyReLU (dropout2 identity), residual, LeakyReLU
        for c in range(n_chunks):
            t0 = c * tch
            tc = min(tch, T - t0)
            z = _leaky(conv_chunk(h1_ref, w2_ref, i, b2, pad, dil, t0, tc))
            cur = act_ref[:, pl.ds(maxpad + t0, tc)]       # block input (residual)
            if i == 0 and has_down:
                res = jnp.dot(wd_ref[...], cur.astype(jnp.bfloat16),
                              preferred_element_type=f32) + bd_ref[...]
            else:
                res = cur
            out = _leaky(z + res)
            if i < levels - 1:
                act_ref[:, pl.ds(maxpad + t0, tc)] = out   # next block's input
            else:
                # Last level: write straight to the NCL output (skip the dead
                # scratch store), dropping the zero-padded channels.
                o_ref[0, :, pl.ds(t0, tc)] = out[:c_out, :].astype(o_ref.dtype)

    # TODO(synk): nn.Dropout in training mode (RNG masking) is not modeled;
    #             this kernel implements eval-mode (identity) dropout only.


# ------------------------------ wrapper ---------------------------------------

def tcn_forward(x_ncl, params, out_dtype=jnp.bfloat16):
    """TemporalConvNet.forward: x (B, num_inputs, L) -> (B, hidden, L)."""
    B, c_in, T = x_ncl.shape
    hidden, levels, k = params["hidden"], params["levels"], params["k"]
    Hp = params["Hp"]
    maxpad = (k - 1) * (2 ** (levels - 1))
    tch = min(T, 512)                                   # in-kernel time chunk

    # bf16 I/O (halves input DMA; matmul path is bf16 anyway).  Callers that
    # already hold bf16 activations skip this convert entirely.
    x = x_ncl if x_ncl.dtype == jnp.bfloat16 else x_ncl.astype(jnp.bfloat16)

    kern = functools.partial(
        _tcn_fused_kernel, levels=levels, k=k, T=T, Hp=Hp, c_in=c_in,
        c_out=hidden, maxpad=maxpad, has_down=params["has_down"], tch=tch)

    # Explicit VMEM budget (feedback: v7x has 64 MiB physical / 32 MiB scoped).
    w_bytes = sum(int(params[n].size) * params[n].dtype.itemsize
                  for n in ("w1", "b1", "w2", "b2", "wd", "bd"))
    scratch_bytes = 2 * Hp * (maxpad + T) * 4
    block_bytes = 2 * (c_in * T * 2 + hidden * T * 2)   # double-buffered x / o
    est = scratch_bytes + 2 * w_bytes + block_bytes     # weights double-buffered
    vmem_limit = int(min(max(2 * est, 16 * 2**20), 32 * 2**20))

    flops = 2 * B * T * Hp * Hp * (2 * k * levels +
                                   (1 if params["has_down"] else 0))
    bytes_accessed = int(x.size) * 2 + B * hidden * T * 2 + w_bytes

    out = pl.pallas_call(
        kern,
        out_shape=jax.ShapeDtypeStruct((B, hidden, T), out_dtype),
        grid=(B,),
        in_specs=[
            pl.BlockSpec((1, c_in, T), lambda b: (b, 0, 0)),
            # Weight/bias blocks have constant index maps, so Pallas fetches
            # them once.  (Single-buffering via pipeline_mode=pl.Buffered(1)
            # would additionally reclaim their double-buffer VMEM.)
            pl.BlockSpec(params["w1"].shape, lambda b: (0, 0, 0, 0)),
            pl.BlockSpec(params["b1"].shape, lambda b: (0, 0, 0)),
            pl.BlockSpec(params["w2"].shape, lambda b: (0, 0, 0, 0)),
            pl.BlockSpec(params["b2"].shape, lambda b: (0, 0, 0)),
            pl.BlockSpec(params["wd"].shape, lambda b: (0, 0)),
            pl.BlockSpec(params["bd"].shape, lambda b: (0, 0)),
        ],
        out_specs=pl.BlockSpec((1, hidden, T), lambda b: (b, 0, 0)),
        scratch_shapes=[pltpu.VMEM((Hp, maxpad + T), jnp.float32),
                        pltpu.VMEM((Hp, maxpad + T), jnp.float32)],
        compiler_params=pltpu.CompilerParams(
            dimension_semantics=("parallel",),
            vmem_limit_bytes=vmem_limit),
        cost_estimate=pl.CostEstimate(flops=flops, transcendentals=0,
                                      bytes_accessed=bytes_accessed),
    )(x, params["w1"], params["b1"], params["w2"], params["b2"],
      params["wd"], params["bd"])
    return out   # already (B, hidden, L) NCL; no wrapper transpose/slice/pad


# ------------------------ parameter construction -----------------------------

def init_tcn_params(key, num_inputs, hidden, levels, k):
    """Parameters matching TemporalConvNet(num_inputs, [hidden]*levels, k)."""
    assert num_inputs <= hidden, "channel padding assumes num_inputs <= hidden"
    Hp = max(128, _round_up(hidden, 128))   # lane/MXU-friendly channel padding

    def weight_norm_conv(key, cin, cout, ksize):
        # weight_norm(Conv1d): at init g = ||v|| per out-channel, so the
        # effective forward weight equals v.  (Loading a trained checkpoint
        # requires folding g * v/||v|| into these packed weights host-side.)
        kv, kb = jax.random.split(key)
        v = 0.01 * jax.random.normal(kv, (cout, cin, ksize), jnp.float32)
        bound = 1.0 / np.sqrt(cin * ksize)
        b = jax.random.uniform(kb, (cout,), jnp.float32, -bound, bound)
        return v, b

    def pack_w(w, cin):
        # (Cout, Cin, k) -> per-tap (k, Cout, Cin), channel-padded to (k, Hp, Hp)
        wt = jnp.transpose(w, (2, 0, 1))
        return jnp.pad(wt, ((0, 0), (0, Hp - hidden), (0, Hp - cin)))

    def pack_b(b):
        return jnp.pad(b, (0, Hp - hidden)).reshape(Hp, 1)

    w1s, b1s, w2s, b2s = [], [], [], []
    wd = jnp.zeros((Hp, Hp), jnp.float32)
    bd = jnp.zeros((Hp, 1), jnp.float32)
    has_down = num_inputs != hidden
    for i in range(levels):
        cin = num_inputs if i == 0 else hidden
        key, k1, k2 = jax.random.split(key, 3)
        w1, b1 = weight_norm_conv(k1, cin, hidden, k)
        w2, b2 = weight_norm_conv(k2, hidden, hidden, k)
        w1s.append(pack_w(w1, cin)); b1s.append(pack_b(b1))
        w2s.append(pack_w(w2, hidden)); b2s.append(pack_b(b2))
    if has_down:
        key, kd = jax.random.split(key)
        kv, kb = jax.random.split(kd)
        v = 0.01 * jax.random.normal(kv, (hidden, num_inputs), jnp.float32)
        wd = jnp.pad(v, ((0, Hp - hidden), (0, Hp - num_inputs)))
        bound = 1.0 / np.sqrt(num_inputs)
        bd = jnp.pad(jax.random.uniform(kb, (hidden,), jnp.float32,
                                        -bound, bound),
                     (0, Hp - hidden)).reshape(Hp, 1)

    return {
        "w1": jnp.stack(w1s).astype(jnp.bfloat16),   # (levels, k, Hp, Hp)
        "b1": jnp.stack(b1s),                        # (levels, Hp, 1)
        "w2": jnp.stack(w2s).astype(jnp.bfloat16),
        "b2": jnp.stack(b2s),
        "wd": wd.astype(jnp.bfloat16),               # (Hp, Hp)
        "bd": bd,                                    # (Hp, 1)
        "hidden": hidden, "levels": levels, "k": k, "Hp": Hp,
        "has_down": has_down,
    }


# ---------------------------- pure-JAX reference ------------------------------

def tcn_reference(x_ncl, params):
    """f32 reference (channels-first) using the same packed weights."""
    hidden, levels, k, Hp = (params["hidden"], params["levels"],
                             params["k"], params["Hp"])
    B, C, T = x_ncl.shape
    x = jnp.pad(x_ncl.astype(jnp.float32), ((0, 0), (0, Hp - C), (0, 0)))
    w1 = params["w1"].astype(jnp.float32)
    w2 = params["w2"].astype(jnp.float32)
    wd = params["wd"].astype(jnp.float32)

    def conv(a, w, b, pad, dil):                           # a: (B, Hp, T)
        ap = jnp.pad(a, ((0, 0), (0, 0), (pad, 0)))
        out = sum(jnp.einsum("oc,bct->bot", w[j], ap[:, :, j * dil:j * dil + T])
                  for j in range(k))
        return out + b[None]

    for i in range(levels):
        dil = 2 ** i
        pad = (k - 1) * dil
        h1 = _leaky(conv(x, w1[i], params["b1"][i], pad, dil))
        z = _leaky(conv(h1, w2[i], params["b2"][i], pad, dil))
        if i == 0 and params["has_down"]:
            res = jnp.einsum("oc,bct->bot", wd, x) + params["bd"][None]
        else:
            res = x
        x = _leaky(z + res)
    return x[:, :hidden, :]


# -------------------------------- main ----------------------------------------

if __name__ == "__main__":
    key = jax.random.PRNGKey(0)

    # small config: TemporalConvNet(num_inputs=4, num_channels=[32]*2, kernel_size=2)
    batch, num_inputs, seq_len = 2, 4, 16
    hidden, levels, kernel_size = 32, 2, 2

    key, kp, kx = jax.random.split(key, 3)
    params = init_tcn_params(kp, num_inputs, hidden, levels, kernel_size)
    x = jax.random.normal(kx, (batch, num_inputs, seq_len), jnp.float32)  # (B, C, L)

    out = tcn_forward(x, params)
    out = jax.block_until_ready(out)
    assert out.shape == (batch, hidden, seq_len)

    ref = tcn_reference(x, params)
    np.testing.assert_allclose(np.asarray(out.astype(jnp.float32)),
                               np.asarray(ref), atol=5e-2, rtol=5e-2)
    print("KERNEL_OK")
</pallas_src>

<mosaic_0001>
module attributes {stable_mosaic.version = 11 : i64} {
  func.func @_tcn_fused_kernel(%arg0: i32, %arg1: memref<1x4x16xbf16, #tpu.memory_space<vmem>>, %arg2: memref<2x2x128x128xbf16, #tpu.memory_space<vmem>>, %arg3: memref<2x128x1xf32, #tpu.memory_space<vmem>>, %arg4: memref<2x2x128x128xbf16, #tpu.memory_space<vmem>>, %arg5: memref<2x128x1xf32, #tpu.memory_space<vmem>>, %arg6: memref<128x128xbf16, #tpu.memory_space<vmem>>, %arg7: memref<128x1xf32, #tpu.memory_space<vmem>>, %arg8: memref<1x32x16xbf16, #tpu.memory_space<vmem>>, %arg9: memref<128x18xf32, #tpu.memory_space<vmem>>, %arg10: memref<128x18xf32, #tpu.memory_space<vmem>>) attributes {dimension_semantics = [#tpu.dimension_semantics<parallel>], iteration_bounds = array<i64: 2>, scalar_prefetch = 0 : i64, scratch_operands = 2 : i64, tpu.core_type = #tpu.core_type<tc>, window_params = [{transform_indices = @transform_0, window_bounds = array<i64: 1, 4, 16>}, {pipeline_mode = #tpu.pipeline_mode<synchronous>, transform_indices = @transform_1, window_bounds = array<i64: 2, 2, 128, 128>}, {pipeline_mode = #tpu.pipeline_mode<synchronous>, transform_indices = @transform_2, window_bounds = array<i64: 2, 128, 1>}, {pipeline_mode = #tpu.pipeline_mode<synchronous>, transform_indices = @transform_3, window_bounds = array<i64: 2, 2, 128, 128>}, {pipeline_mode = #tpu.pipeline_mode<synchronous>, transform_indices = @transform_4, window_bounds = array<i64: 2, 128, 1>}, {pipeline_mode = #tpu.pipeline_mode<synchronous>, transform_indices = @transform_5, window_bounds = array<i64: 128, 128>}, {pipeline_mode = #tpu.pipeline_mode<synchronous>, transform_indices = @transform_6, window_bounds = array<i64: 128, 1>}, {transform_indices = @transform_7, window_bounds = array<i64: 1, 32, 16>}]} {
    %cst = arith.constant 0.000000e+00 : f32
    %0 = vector.broadcast %cst : f32 to vector<128x2xf32>
    %c0 = arith.constant 0 : index
    %c0_0 = arith.constant 0 : index
    %1 = vector.load %arg9[%c0, %c0_0] : memref<128x18xf32, #tpu.memory_space<vmem>>, vector<128x2xf32>
    tpu.vector_store %arg9[%c0, %c0_0], %0 {strides = array<i32>} : memref<128x18xf32, #tpu.memory_space<vmem>>, vector<128x2xf32>,
    %c0_1 = arith.constant 0 : index
    %c0_2 = arith.constant 0 : index
    %2 = vector.load %arg10[%c0_1, %c0_2] : memref<128x18xf32, #tpu.memory_space<vmem>>, vector<128x2xf32>
    tpu.vector_store %arg10[%c0_1, %c0_2], %0 {strides = array<i32>} : memref<128x18xf32, #tpu.memory_space<vmem>>, vector<128x2xf32>,
    %c0_3 = arith.constant 0 : index
    %c0_4 = arith.constant 0 : index
    %c0_5 = arith.constant 0 : index
    %3 = vector.load %arg1[%c0_3, %c0_4, %c0_5] : memref<1x4x16xbf16, #tpu.memory_space<vmem>>, vector<1x4x16xbf16>
    %4 = vector.shape_cast %3 : vector<1x4x16xbf16> to vector<4x16xbf16>
    %5 = arith.extf %4 : vector<4x16xbf16> to vector<4x16xf32>
    %cst_6 = arith.constant 0.000000e+00 : f32
    %6 = vector.broadcast %cst_6 : f32 to vector<124x16xf32>
    %7 = tpu.concatenate %5, %6 in 0 : vector<4x16xf32>, vector<124x16xf32> -> vector<128x16xf32>
    %c0_7 = arith.constant 0 : index
    %c2 = arith.constant 2 : index
    %8 = vector.load %arg9[%c0_7, %c2] : memref<128x18xf32, #tpu.memory_space<vmem>>, vector<128x16xf32>
    tpu.vector_store %arg9[%c0_7, %c2], %7 {strides = array<i32>} : memref<128x18xf32, #tpu.memory_space<vmem>>, vector<128x16xf32>,
    %c0_8 = arith.constant 0 : index
    %c0_9 = arith.constant 0 : index
    %c0_10 = arith.constant 0 : index
    %9 = vector.load %arg3[%c0_8, %c0_9, %c0_10] : memref<2x128x1xf32, #tpu.memory_space<vmem>>, vector<1x128x1xf32>
    %10 = vector.shape_cast %9 : vector<1x128x1xf32> to vector<128x1xf32>
    %c0_11 = arith.constant 0 : index
    %c0_12 = arith.constant 0 : index
    %c0_13 = arith.constant 0 : index
    %11 = vector.load %arg5[%c0_11, %c0_12, %c0_13] : memref<2x128x1xf32, #tpu.memory_space<vmem>>, vector<1x128x1xf32>
    %12 = vector.shape_cast %11 : vector<1x128x1xf32> to vector<128x1xf32>
    %c0_14 = arith.constant 0 : index
    %c1 = arith.constant 1 : index
    %13 = vector.load %arg9[%c0_14, %c1] : memref<128x18xf32, #tpu.memory_space<vmem>>, vector<128x16xf32>
    %c0_15 = arith.constant 0 : index
    %c0_16 = arith.constant 0 : index
    %c0_17 = arith.constant 0 : index
    %c0_18 = arith.constant 0 : index
    %14 = vector.load %arg2[%c0_15, %c0_16, %c0_17, %c0_18] : memref<2x2x128x128xbf16, #tpu.memory_space<vmem>>, vector<1x1x128x128xbf16>
    %15 = vector.shape_cast %14 : vector<1x1x128x128xbf16> to vector<128x128xbf16>
    %16 = arith.truncf %13 : vector<128x16xf32> to vector<128x16xbf16>
    %cst_19 = arith.constant dense<0.000000e+00> : vector<128x16xf32>
    %17 = tpu.matmul %15, %16, %cst_19 {dimension_numbers = #tpu.dot_dimension_numbers<[1], [0], [0], [1], [0, 0, 1, 1], [], []>} : vector<128x128xbf16>, vector<128x16xbf16>, vector<128x16xf32> -> vector<128x16xf32>
    %c0_20 = arith.constant 0 : index
    %c2_21 = arith.constant 2 : index
    %18 = vector.load %arg9[%c0_20, %c2_21] : memref<128x18xf32, #tpu.memory_space<vmem>>, vector<128x16xf32>
    %c0_22 = arith.constant 0 : index
    %c1_23 = arith.constant 1 : index
    %c0_24 = arith.constant 0 : index
    %c0_25 = arith.constant 0 : index
    %19 = vector.load %arg2[%c0_22, %c1_23, %c0_24, %c0_25] : memref<2x2x128x128xbf16, #tpu.memory_space<vmem>>, vector<1x1x128x128xbf16>
    %20 = vector.shape_cast %19 : vector<1x1x128x128xbf16> to vector<128x128xbf16>
    %21 = arith.truncf %18 : vector<128x16xf32> to vector<128x16xbf16>
    %cst_26 = arith.constant dense<0.000000e+00> : vector<128x16xf32>
    %22 = tpu.matmul %20, %21, %cst_26 {dimension_numbers = #tpu.dot_dimension_numbers<[1], [0], [0], [1], [0, 0, 1, 1], [], []>} : vector<128x128xbf16>, vector<128x16xbf16>, vector<128x16xf32> -> vector<128x16xf32>
    %23 = arith.addf %17, %22 : vector<128x16xf32>
    %24 = vector.broadcast %10 : vector<128x1xf32> to vector<128x16xf32>
    %25 = arith.addf %23, %24 : vector<128x16xf32>
    %cst_27 = arith.constant 0.000000e+00 : f32
    %26 = vector.broadcast %cst_27 : f32 to vector<128x16xf32>
    %27 = arith.cmpf oge, %25, %26 : vector<128x16xf32>
    %cst_28 = arith.constant 0.00999999977 : f32
    %28 = vector.broadcast %cst_28 : f32 to vector<128x16xf32>
    %29 = arith.mulf %28, %25 : vector<128x16xf32>
    %30 = arith.select %27, %25, %29 : vector<128x16xi1>, vector<128x16xf32>
    %c0_29 = arith.constant 0 : index
    %c2_30 = arith.constant 2 : index
    %31 = vector.load %arg10[%c0_29, %c2_30] : memref<128x18xf32, #tpu.memory_space<vmem>>, vector<128x16xf32>
    tpu.vector_store %arg10[%c0_29, %c2_30], %30 {strides = array<i32>} : memref<128x18xf32, #tpu.memory_space<vmem>>, vector<128x16xf32>,
    %c0_31 = arith.constant 0 : index
    %c1_32 = arith.constant 1 : index
    %32 = vector.load %arg10[%c0_31, %c1_32] : memref<128x18xf32, #tpu.memory_space<vmem>>, vector<128x16xf32>
    %c0_33 = arith.constant 0 : index
    %c0_34 = arith.constant 0 : index
    %c0_35 = arith.constant 0 : index
    %c0_36 = arith.constant 0 : index
    %33 = vector.load %arg4[%c0_33, %c0_34, %c0_35, %c0_36] : memref<2x2x128x128xbf16, #tpu.memory_space<vmem>>, vector<1x1x128x128xbf16>
    %34 = vector.shape_cast %33 : vector<1x1x128x128xbf16> to vector<128x128xbf16>
    %35 = arith.truncf %32 : vector<128x16xf32> to vector<128x16xbf16>
    %cst_37 = arith.constant dense<0.000000e+00> : vector<128x16xf32>
    %36 = tpu.matmul %34, %35, %cst_37 {dimension_numbers = #tpu.dot_dimension_numbers<[1], [0], [0], [1], [0, 0, 1, 1], [], []>} : vector<128x128xbf16>, vector<128x16xbf16>, vector<128x16xf32> -> vector<128x16xf32>
    %c0_38 = arith.constant 0 : index
    %c2_39 = arith.constant 2 : index
    %37 = vector.load %arg10[%c0_38, %c2_39] : memref<128x18xf32, #tpu.memory_space<vmem>>, vector<128x16xf32>
    %c0_40 = arith.constant 0 : index
    %c1_41 = arith.constant 1 : index
    %c0_42 = arith.constant 0 : index
    %c0_43 = arith.constant 0 : index
    %38 = vector.load %arg4[%c0_40, %c1_41, %c0_42, %c0_43] : memref<2x2x128x128xbf16, #tpu.memory_space<vmem>>, vector<1x1x128x128xbf16>
    %39 = vector.shape_cast %38 : vector<1x1x128x128xbf16> to vector<128x128xbf16>
    %40 = arith.truncf %37 : vector<128x16xf32> to vector<128x16xbf16>
    %cst_44 = arith.constant dense<0.000000e+00> : vector<128x16xf32>
    %41 = tpu.matmul %39, %40, %cst_44 {dimension_numbers = #tpu.dot_dimension_numbers<[1], [0], [0], [1], [0, 0, 1, 1], [], []>} : vector<128x128xbf16>, vector<128x16xbf16>, vector<128x16xf32> -> vector<128x16xf32>
    %42 = arith.addf %36, %41 : vector<128x16xf32>
    %43 = vector.broadcast %12 : vector<128x1xf32> to vector<128x16xf32>
    %44 = arith.addf %42, %43 : vector<128x16xf32>
    %cst_45 = arith.constant 0.000000e+00 : f32
    %45 = vector.broadcast %cst_45 : f32 to vector<128x16xf32>
    %46 = arith.cmpf oge, %44, %45 : vector<128x16xf32>
    %cst_46 = arith.constant 0.00999999977 : f32
    %47 = vector.broadcast %cst_46 : f32 to vector<128x16xf32>
    %48 = arith.mulf %47, %44 : vector<128x16xf32>
    %49 = arith.select %46, %44, %48 : vector<128x16xi1>, vector<128x16xf32>
    %c0_47 = arith.constant 0 : index
    %c2_48 = arith.constant 2 : index
    %50 = vector.load %arg9[%c0_47, %c2_48] : memref<128x18xf32, #tpu.memory_space<vmem>>, vector<128x16xf32>
    %c0_49 = arith.constant 0 : index
    %c0_50 = arith.constant 0 : index
    %51 = vector.load %arg6[%c0_49, %c0_50] : memref<128x128xbf16, #tpu.memory_space<vmem>>, vector<128x128xbf16>
    %52 = arith.truncf %50 : vector<128x16xf32> to vector<128x16xbf16>
    %cst_51 = arith.constant dense<0.000000e+00> : vector<128x16xf32>
    %53 = tpu.matmul %51, %52, %cst_51 {dimension_numbers = #tpu.dot_dimension_numbers<[1], [0], [0], [1], [0, 0, 1, 1], [], []>} : vector<128x128xbf16>, vector<128x16xbf16>, vector<128x16xf32> -> vector<128x16xf32>
    %c0_52 = arith.constant 0 : index
    %c0_53 = arith.constant 0 : index
    %54 = vector.load %arg7[%c0_52, %c0_53] : memref<128x1xf32, #tpu.memory_space<vmem>>, vector<128x1xf32>
    %55 = vector.broadcast %54 : vector<128x1xf32> to vector<128x16xf32>
    %56 = arith.addf %53, %55 : vector<128x16xf32>
    %57 = arith.addf %49, %56 : vector<128x16xf32>
    %cst_54 = arith.constant 0.000000e+00 : f32
    %58 = vector.broadcast %cst_54 : f32 to vector<128x16xf32>
    %59 = arith.cmpf oge, %57, %58 : vector<128x16xf32>
    %cst_55 = arith.constant 0.00999999977 : f32
    %60 = vector.broadcast %cst_55 : f32 to vector<128x16xf32>
    %61 = arith.mulf %60, %57 : vector<128x16xf32>
    %62 = arith.select %59, %57, %61 : vector<128x16xi1>, vector<128x16xf32>
    %c0_56 = arith.constant 0 : index
    %c2_57 = arith.constant 2 : index
    %63 = vector.load %arg9[%c0_56, %c2_57] : memref<128x18xf32, #tpu.memory_space<vmem>>, vector<128x16xf32>
    tpu.vector_store %arg9[%c0_56, %c2_57], %62 {strides = array<i32>} : memref<128x18xf32, #tpu.memory_space<vmem>>, vector<128x16xf32>,
    %c1_58 = arith.constant 1 : index
    %c0_59 = arith.constant 0 : index
    %c0_60 = arith.constant 0 : index
    %64 = vector.load %arg3[%c1_58, %c0_59, %c0_60] : memref<2x128x1xf32, #tpu.memory_space<vmem>>, vector<1x128x1xf32>
    %65 = vector.shape_cast %64 : vector<1x128x1xf32> to vector<128x1xf32>
    %c1_61 = arith.constant 1 : index
    %c0_62 = arith.constant 0 : index
    %c0_63 = arith.constant 0 : index
    %66 = vector.load %arg5[%c1_61, %c0_62, %c0_63] : memref<2x128x1xf32, #tpu.memory_space<vmem>>, vector<1x128x1xf32>
    %67 = vector.shape_cast %66 : vector<1x128x1xf32> to vector<128x1xf32>
    %c0_64 = arith.constant 0 : index
    %c0_65 = arith.constant 0 : index
    %68 = vector.load %arg9[%c0_64, %c0_65] : memref<128x18xf32, #tpu.memory_space<vmem>>, vector<128x16xf32>
    %c1_66 = arith.constant 1 : index
    %c0_67 = arith.constant 0 : index
    %c0_68 = arith.constant 0 : index
    %c0_69 = arith.constant 0 : index
    %69 = vector.load %arg2[%c1_66, %c0_67, %c0_68, %c0_69] : memref<2x2x128x128xbf16, #tpu.memory_space<vmem>>, vector<1x1x128x128xbf16>
    %70 = vector.shape_cast %69 : vector<1x1x128x128xbf16> to vector<128x128xbf16>
    %71 = arith.truncf %68 : vector<128x16xf32> to vector<128x16xbf16>
    %cst_70 = arith.constant dense<0.000000e+00> : vector<128x16xf32>
    %72 = tpu.matmul %70, %71, %cst_70 {dimension_numbers = #tpu.dot_dimension_numbers<[1], [0], [0], [1], [0, 0, 1, 1], [], []>} : vector<128x128xbf16>, vector<128x16xbf16>, vector<128x16xf32> -> vector<128x16xf32>
    %c0_71 = arith.constant 0 : index
    %c2_72 = arith.constant 2 : index
    %73 = vector.load %arg9[%c0_71, %c2_72] : memref<128x18xf32, #tpu.memory_space<vmem>>, vector<128x16xf32>
    %c1_73 = arith.constant 1 : index
    %c1_74 = arith.constant 1 : index
    %c0_75 = arith.constant 0 : index
    %c0_76 = arith.constant 0 : index
    %74 = vector.load %arg2[%c1_73, %c1_74, %c0_75, %c0_76] : memref<2x2x128x128xbf16, #tpu.memory_space<vmem>>, vector<1x1x128x128xbf16>
    %75 = vector.shape_cast %74 : vector<1x1x128x128xbf16> to vector<128x128xbf16>
    %76 = arith.truncf %73 : vector<128x16xf32> to vector<128x16xbf16>
    %cst_77 = arith.constant dense<0.000000e+00> : vector<128x16xf32>
    %77 = tpu.matmul %75, %76, %cst_77 {dimension_numbers = #tpu.dot_dimension_numbers<[1], [0], [0], [1], [0, 0, 1, 1], [], []>} : vector<128x128xbf16>, vector<128x16xbf16>, vector<128x16xf32> -> vector<128x16xf32>
    %78 = arith.addf %72, %77 : vector<128x16xf32>
    %79 = vector.broadcast %65 : vector<128x1xf32> to vector<128x16xf32>
    %80 = arith.addf %78, %79 : vector<128x16xf32>
    %cst_78 = arith.constant 0.000000e+00 : f32
    %81 = vector.broadcast %cst_78 : f32 to vector<128x16xf32>
    %82 = arith.cmpf oge, %80, %81 : vector<128x16xf32>
    %cst_79 = arith.constant 0.00999999977 : f32
    %83 = vector.broadcast %cst_79 : f32 to vector<128x16xf32>
    %84 = arith.mulf %83, %80 : vector<128x16xf32>
    %85 = arith.select %82, %80, %84 : vector<128x16xi1>, vector<128x16xf32>
    %c0_80 = arith.constant 0 : index
    %c2_81 = arith.constant 2 : index
    %86 = vector.load %arg10[%c0_80, %c2_81] : memref<128x18xf32, #tpu.memory_space<vmem>>, vector<128x16xf32>
    tpu.vector_store %arg10[%c0_80, %c2_81], %85 {strides = array<i32>} : memref<128x18xf32, #tpu.memory_space<vmem>>, vector<128x16xf32>,
    %c0_82 = arith.constant 0 : index
    %c0_83 = arith.constant 0 : index
    %87 = vector.load %arg10[%c0_82, %c0_83] : memref<128x18xf32, #tpu.memory_space<vmem>>, vector<128x16xf32>
    %c1_84 = arith.constant 1 : index
    %c0_85 = arith.constant 0 : index
    %c0_86 = arith.constant 0 : index
    %c0_87 = arith.constant 0 : index
    %88 = vector.load %arg4[%c1_84, %c0_85, %c0_86, %c0_87] : memref<2x2x128x128xbf16, #tpu.memory_space<vmem>>, vector<1x1x128x128xbf16>
    %89 = vector.shape_cast %88 : vector<1x1x128x128xbf16> to vector<128x128xbf16>
    %90 = arith.truncf %87 : vector<128x16xf32> to vector<128x16xbf16>
    %cst_88 = arith.constant dense<0.000000e+00> : vector<128x16xf32>
    %91 = tpu.matmul %89, %90, %cst_88 {dimension_numbers = #tpu.dot_dimension_numbers<[1], [0], [0], [1], [0, 0, 1, 1], [], []>} : vector<128x128xbf16>, vector<128x16xbf16>, vector<128x16xf32> -> vector<128x16xf32>
    %c0_89 = arith.constant 0 : index
    %c2_90 = arith.constant 2 : index
    %92 = vector.load %arg10[%c0_89, %c2_90] : memref<128x18xf32, #tpu.memory_space<vmem>>, vector<128x16xf32>
    %c1_91 = arith.constant 1 : index
    %c1_92 = arith.constant 1 : index
    %c0_93 = arith.constant 0 : index
    %c0_94 = arith.constant 0 : index
    %93 = vector.load %arg4[%c1_91, %c1_92, %c0_93, %c0_94] : memref<2x2x128x128xbf16, #tpu.memory_space<vmem>>, vector<1x1x128x128xbf16>
    %94 = vector.shape_cast %93 : vector<1x1x128x128xbf16> to vector<128x128xbf16>
    %95 = arith.truncf %92 : vector<128x16xf32> to vector<128x16xbf16>
    %cst_95 = arith.constant dense<0.000000e+00> : vector<128x16xf32>
    %96 = tpu.matmul %94, %95, %cst_95 {dimension_numbers = #tpu.dot_dimension_numbers<[1], [0], [0], [1], [0, 0, 1, 1], [], []>} : vector<128x128xbf16>, vector<128x16xbf16>, vector<128x16xf32> -> vector<128x16xf32>
    %97 = arith.addf %91, %96 : vector<128x16xf32>
    %98 = vector.broadcast %67 : vector<128x1xf32> to vector<128x16xf32>
    %99 = arith.addf %97, %98 : vector<128x16xf32>
    %cst_96 = arith.constant 0.000000e+00 : f32
    %100 = vector.broadcast %cst_96 : f32 to vector<128x16xf32>
    %101 = arith.cmpf oge, %99, %100 : vector<128x16xf32>
    %cst_97 = arith.constant 0.00999999977 : f32
    %102 = vector.broadcast %cst_97 : f32 to vector<128x16xf32>
    %103 = arith.mulf %102, %99 : vector<128x16xf32>
    %104 = arith.select %101, %99, %103 : vector<128x16xi1>, vector<128x16xf32>
    %c0_98 = arith.constant 0 : index
    %c2_99 = arith.constant 2 : index
    %105 = vector.load %arg9[%c0_98, %c2_99] : memref<128x18xf32, #tpu.memory_space<vmem>>, vector<128x16xf32>
    %106 = arith.addf %104, %105 : vector<128x16xf32>
    %cst_100 = arith.constant 0.000000e+00 : f32
    %107 = vector.broadcast %cst_100 : f32 to vector<128x16xf32>
    %108 = arith.cmpf oge, %106, %107 : vector<128x16xf32>
    %cst_101 = arith.constant 0.00999999977 : f32
    %109 = vector.broadcast %cst_101 : f32 to vector<128x16xf32>
    %110 = arith.mulf %109, %106 : vector<128x16xf32>
    %111 = arith.select %108, %106, %110 : vector<128x16xi1>, vector<128x16xf32>
    %112 = vector.extract_strided_slice %111 {offsets = [0, 0], sizes = [32, 16], strides = [1, 1]} : vector<128x16xf32> to vector<32x16xf32>
    %113 = arith.truncf %112 : vector<32x16xf32> to vector<32x16xbf16>
    %c0_102 = arith.constant 0 : index
    %c0_103 = arith.constant 0 : index
    %c0_104 = arith.constant 0 : index
    %114 = vector.load %arg8[%c0_102, %c0_103, %c0_104] : memref<1x32x16xbf16, #tpu.memory_space<vmem>>, vector<1x32x16xbf16>
    %115 = vector.shape_cast %114 : vector<1x32x16xbf16> to vector<32x16xbf16>
    %116 = vector.shape_cast %113 : vector<32x16xbf16> to vector<1x32x16xbf16>
    tpu.vector_store %arg8[%c0_102, %c0_103, %c0_104], %116 {strides = array<i32>} : memref<1x32x16xbf16, #tpu.memory_space<vmem>>, vector<1x32x16xbf16>,
    return
  }
  func.func @transform_0(%arg0: i32) -> (i32, i32, i32) {
    %c0_i32 = arith.constant 0 : i32
    %c0_i32_0 = arith.constant 0 : i32
    %c0_i32_1 = arith.constant 0 : i32
    return %arg0, %c0_i32, %c0_i32_0 : i32, i32, i32
  }
  func.func @transform_1(%arg0: i32) -> (i32, i32, i32, i32) {
    %c0_i32 = arith.constant 0 : i32
    %c0_i32_0 = arith.constant 0 : i32
    %c0_i32_1 = arith.constant 0 : i32
    %c0_i32_2 = arith.constant 0 : i32
    %c0_i32_3 = arith.constant 0 : i32
    return %c0_i32, %c0_i32_0, %c0_i32_1, %c0_i32_2 : i32, i32, i32, i32
  }
  func.func @transform_2(%arg0: i32) -> (i32, i32, i32) {
    %c0_i32 = arith.constant 0 : i32
    %c0_i32_0 = arith.constant 0 : i32
    %c0_i32_1 = arith.constant 0 : i32
    %c0_i32_2 = arith.constant 0 : i32
    return %c0_i32, %c0_i32_0, %c0_i32_1 : i32, i32, i32
  }
  func.func @transform_3(%arg0: i32) -> (i32, i32, i32, i32) {
    %c0_i32 = arith.constant 0 : i32
    %c0_i32_0 = arith.constant 0 : i32
    %c0_i32_1 = arith.constant 0 : i32
    %c0_i32_2 = arith.constant 0 : i32
    %c0_i32_3 = arith.constant 0 : i32
    return %c0_i32, %c0_i32_0, %c0_i32_1, %c0_i32_2 : i32, i32, i32, i32
  }
  func.func @transform_4(%arg0: i32) -> (i32, i32, i32) {
    %c0_i32 = arith.constant 0 : i32
    %c0_i32_0 = arith.constant 0 : i32
    %c0_i32_1 = arith.constant 0 : i32
    %c0_i32_2 = arith.constant 0 : i32
    return %c0_i32, %c0_i32_0, %c0_i32_1 : i32, i32, i32
  }
  func.func @transform_5(%arg0: i32) -> (i32, i32) {
    %c0_i32 = arith.constant 0 : i32
    %c0_i32_0 = arith.constant 0 : i32
    %c0_i32_1 = arith.constant 0 : i32
    return %c0_i32, %c0_i32_0 : i32, i32
  }
  func.func @transform_6(%arg0: i32) -> (i32, i32) {
    %c0_i32 = arith.constant 0 : i32
    %c0_i32_0 = arith.constant 0 : i32
    %c0_i32_1 = arith.constant 0 : i32
    return %c0_i32, %c0_i32_0 : i32, i32
  }
  func.func @transform_7(%arg0: i32) -> (i32, i32, i32) {
    %c0_i32 = arith.constant 0 : i32
    %c0_i32_0 = arith.constant 0 : i32
    %c0_i32_1 = arith.constant 0 : i32
    return %arg0, %c0_i32, %c0_i32_0 : i32, i32, i32
  }
}

</mosaic_0001>

<bundles_post_ra>
// kernel: tpu_custom_call.1
= control target key start
LH: loop header
LB: loop body
LE: loop exit
PB: predicated region body
PF: predicated region fallthrough
CT: control target
= control target key end

     0   :  { %s3267_s24 = smov 0   ;;  %s4172_s0 = inlined_call_operand.vmem [shape: bf16[2,4,16], index: 0, kind: input, shape index: {}]   ;;  %s4173_s1 = inlined_call_operand.vmem [shape: bf16[2,2,128,128], index: 1, kind: input, shape index: {}]   ;;  %s4174_s2 = inlined_call_operand.vmem [shape: f32[2,128,1], index: 2, kind: input, shape index: {}]   ;;  %s4175_s3 = inlined_call_operand.vmem [shape: bf16[2,2,128,128], index: 3, kind: input, shape index: {}]   ;;  %s4176_s4 = inlined_call_operand.vmem [shape: f32[2,128,1], index: 4, kind: input, shape index: {}]   ;;  %s4177_s5 = inlined_call_operand.vmem [shape: bf16[128,128], index: 5, kind: input, shape index: {}]   ;;  %s4178_s6 = inlined_call_operand.vmem [shape: f32[128,1], index: 6, kind: input, shape index: {}]   ;;  %s4179_s7 = inlined_call_operand.vmem [shape: bf16[2,32,16], index: 7, kind: output, shape index: {}]  }
   0x1 LB: > { %s2687_s25 = sadd.s32 4294967295, %s3220_s24   ;;  %p2691_p0 = scmp.ge.s32.totalorder %s3220_s24, 1  ;;  %s3220_s24 = sphi %s3267_s24, %s17_s24  }
   0x2   : > { %p236_p1 = scmp.lt.s32.totalorder %s3220_s24, 3 }
   0x4   : > { %p237_p2 = pnand %p2691_p0, %p236_p1 }
   0x5   : > { %p267_p3 = scmp.lt.s32.totalorder (!%p237_p2), %s2687_s25, 1  ;;  %s3223_s26 = smov (!%p237_p2), 2  }
   0x6   : > { %240 = sbr.rel (%p237_p2) target bundleno = 2169 (0x879), region = 48  ;;  %s3224_s8 = smov (!%p237_p2), 126  }
   0x7   : > { %s3225_s9 = smov (!%p237_p2), 127  }
   0xb   : > { %v3222_v0 = vmov 0.0   ;;  %s4181_s25 = smov (!%p267_p3, %s2687_s25), 1  ;;  %vm311_vm0 = vcmask 1043456   ;;  %vm276_vm1 = vcmask 15360   ;;  %vm321_vm2 = vcmask 146448   ;;  %v353_v35 = vld [vmem:[%s4174_s2 + $0x78] sm:$0xff] }
   0xc   : > { %317 = vrot.lane.b32.xlu0 %v3222_v0, %s3223_s26  ;;  %s2692_s27 = sshll.u32 %s4181_s25, 1  ;;  %277 = vst.msk [vmem:[#allocation2] sm:$0xff] %vm276_vm1, %v3222_v0  ;;  %v3226_v34 = vmov 0   ;;  %v352_v36 = vld [vmem:[%s4174_s2 + $0x70] sm:$0xff]  ;;  %v351_v39 = vld [vmem:[%s4174_s2 + $0x68] sm:$0xff]  ;;  %v349_v40 = vld [vmem:[%s4174_s2 + $0x58] sm:$0xff] }
   0xd   : > { %s270_s30 = scalar_lea.vmem %s4172_s0, %s2692_s27  ;;  %278 = vst.msk [vmem:[#allocation2 + $0x8] sm:$0xff] %vm276_vm1, %v3222_v0  ;;  %3212 = vset.pattern.permute.xlu1 %v3226_v34  ;;  %3211 = vset.pattern.permute.xlu0 %v3226_v34  ;;  %v3112_v43 = vld [vmem:[%s4173_s1 + $0x50] sm:$0xff]  ;;  %v346_v44 = vld [vmem:[%s4174_s2 + $0x40] sm:$0xff]  ;;  %v345_v49 = vld [vmem:[%s4174_s2 + $0x38] sm:$0xff]  ;;  %s3101_s23 = sshll.u32 %s4181_s25, 4 }
   0xe   : > { %v309_v1 = vld [vmem:[%s270_s30] sm:$0x3]  ;;  %279 = vst.msk [vmem:[#allocation2 + $0x10] sm:$0xff] %vm276_vm1, %v3222_v0  ;;  %3213 = vset.pattern.permute.xlu2 %v3226_v34  ;;  %v344_v45 = vld [vmem:[%s4174_s2 + $0x30] sm:$0xff]  ;;  %v343_v50 = vld [vmem:[%s4174_s2 + $0x28] sm:$0xff]  ;;  %s4159_s27 = scalar_lea.vmem %s4179_s7, %s3101_s23 }
   0xf   : > { %v310_v2 = vunpack.c.l.bf16 %v309_v1  ;;  %280 = vst.msk [vmem:[#allocation2 + $0x18] sm:$0xff] %vm276_vm1, %v3222_v0  ;;  %v3110_v46 = vld [vmem:[%s4173_s1 + $0x40] sm:$0xff]  ;;  %v3113_v53 = vld [vmem:[%s4173_s1 + $0x58] sm:$0xff]  ;;  %v340_v54 = vld [vmem:[%s4174_s2 + $0x10] sm:$0xff] }
  0x10   : > { %281 = vst.msk [vmem:[#allocation2 + $0x20] sm:$0xff] %vm276_vm1, %v3222_v0  ;;  %v338_v55 = vld [vmem:[%s4174_s2] sm:$0xff]  ;;  %v3111_v56 = vld [vmem:[%s4173_s1 + $0x48] sm:$0xff] }
  0x11   : > { %v312_v3 = vsel %vm311_vm0, %v310_v2, 0.0  ;;  %282 = vst.msk [vmem:[#allocation2 + $0x28] sm:$0xff] %vm276_vm1, %v3222_v0  ;;  %v350_v58 = vld [vmem:[%s4174_s2 + $0x60] sm:$0xff]  ;;  %v339_v60 = vld [vmem:[%s4174_s2 + $0x8] sm:$0xff] }
  0x12   : > { %283 = vst.msk [vmem:[#allocation2 + $0x30] sm:$0xff] %vm276_vm1, %v3222_v0  ;;  %v3102_v63 = vld [vmem:[%s4173_s1] sm:$0xff]  ;;  %v347_v1 = vld [vmem:[%s4174_s2 + $0x48] sm:$0xff] }
  0x13   : > { %284 = vst.msk [vmem:[#allocation2 + $0x38] sm:$0xff] %vm276_vm1, %v3222_v0  ;;  %v3103_v2 = vld [vmem:[%s4173_s1 + $0x8] sm:$0xff] }
  0x14   : > { %315 = vrot.lane.b32.xlu0 %v312_v3, %s3223_s26  ;;  %285 = vst.msk [vmem:[#allocation2 + $0x40] sm:$0xff] %vm276_vm1, %v3222_v0  ;;  %v342_v3 = vld [vmem:[%s4174_s2 + $0x20] sm:$0xff] }
  0x15   : > { %286 = vst.msk [vmem:[#allocation2 + $0x48] sm:$0xff] %vm276_vm1, %v3222_v0 }
  0x16   : > { %287 = vst.msk [vmem:[#allocation2 + $0x50] sm:$0xff] %vm276_vm1, %v3222_v0 }
  0x17   : > { %288 = vst.msk [vmem:[#allocation2 + $0x58] sm:$0xff] %vm276_vm1, %v3222_v0 }
  0x18   : > { %289 = vst.msk [vmem:[#allocation2 + $0x60] sm:$0xff] %vm276_vm1, %v3222_v0 }
  0x19   : > { %290 = vst.msk [vmem:[#allocation2 + $0x68] sm:$0xff] %vm276_vm1, %v3222_v0 }
  0x1a   : > { %291 = vst.msk [vmem:[#allocation2 + $0x70] sm:$0xff] %vm276_vm1, %v3222_v0 }
  0x1b   : > { %292 = vst.msk [vmem:[#allocation2 + $0x78] sm:$0xff] %vm276_vm1, %v3222_v0 }
  0x1c   : > { %293 = vst.msk [vmem:[#allocation3] sm:$0xff] %vm276_vm1, %v3222_v0 }
  0x1d   : > { %294 = vst.msk [vmem:[#allocation3 + $0x8] sm:$0xff] %vm276_vm1, %v3222_v0 }
  0x1e   : > { %295 = vst.msk [vmem:[#allocation3 + $0x10] sm:$0xff] %vm276_vm1, %v3222_v0 }
  0x1f   : > { %296 = vst.msk [vmem:[#allocation3 + $0x18] sm:$0xff] %vm276_vm1, %v3222_v0 }
  0x20   : > { %297 = vst.msk [vmem:[#allocation3 + $0x20] sm:$0xff] %vm276_vm1, %v3222_v0 }
  0x21   : > { %298 = vst.msk [vmem:[#allocation3 + $0x28] sm:$0xff] %vm276_vm1, %v3222_v0 }
  0x22   : > { %299 = vst.msk [vmem:[#allocation3 + $0x30] sm:$0xff] %vm276_vm1, %v3222_v0 }
  0x23   : > { %300 = vst.msk [vmem:[#allocation3 + $0x38] sm:$0xff] %vm276_vm1, %v3222_v0 }
  0x24   : > { %301 = vst.msk [vmem:[#allocation3 + $0x40] sm:$0xff] %vm276_vm1, %v3222_v0 }
  0x25   : > { %302 = vst.msk [vmem:[#allocation3 + $0x48] sm:$0xff] %vm276_vm1, %v3222_v0 }
  0x26   : > { %303 = vst.msk [vmem:[#allocation3 + $0x50] sm:$0xff] %vm276_vm1, %v3222_v0 }
  0x27   : > { %304 = vst.msk [vmem:[#allocation3 + $0x58] sm:$0xff] %vm276_vm1, %v3222_v0 }
  0x28   : > { %305 = vst.msk [vmem:[#allocation3 + $0x60] sm:$0xff] %vm276_vm1, %v3222_v0 }
  0x29   : > { %306 = vst.msk [vmem:[#allocation3 + $0x68] sm:$0xff] %vm276_vm1, %v3222_v0 }
  0x2a   : > { %307 = vst.msk [vmem:[#allocation3 + $0x70] sm:$0xff] %vm276_vm1, %v3222_v0 }
  0x2b   : > { %308 = vst.msk [vmem:[#allocation3 + $0x78] sm:$0xff] %vm276_vm1, %v3222_v0  ;;  %v348_v0 = vld [vmem:[%s4174_s2 + $0x50] sm:$0xff] }
  0x7e   : > { %v318_v4 = vpop.permute.xlu0 %317 }
  0x7f   : > { %336 = vst.msk [vmem:[#allocation2 + $0x70] sm:$0xff] %vm321_vm2, %v318_v4 }
  0x80   : > { %337 = vst.msk [vmem:[#allocation2 + $0x78] sm:$0xff] %vm321_vm2, %v318_v4 }
  0x81   : > { %323 = vst.msk [vmem:[#allocation2 + $0x8] sm:$0xff] %vm321_vm2, %v318_v4 }
  0x82   : > { %324 = vst.msk [vmem:[#allocation2 + $0x10] sm:$0xff] %vm321_vm2, %v318_v4 }
  0x83   : > { %325 = vst.msk [vmem:[#allocation2 + $0x18] sm:$0xff] %vm321_vm2, %v318_v4 }
  0x84   : > { %326 = vst.msk [vmem:[#allocation2 + $0x20] sm:$0xff] %vm321_vm2, %v318_v4 }
  0x85   : > { %327 = vst.msk [vmem:[#allocation2 + $0x28] sm:$0xff] %vm321_vm2, %v318_v4 }
  0x86   : > { %v384_v5 = vld [vmem:[#allocation2 + $0x70] sm:$0xff]  ;;  %328 = vst.msk [vmem:[#allocation2 + $0x30] sm:$0xff] %vm321_vm2, %v318_v4  ;;  %v316_v6 = vpop.permute.xlu0 %315 }
  0x87   : > { %v385_v7 = vld [vmem:[#allocation2 + $0x78] sm:$0xff]  ;;  %329 = vst.msk [vmem:[#allocation2 + $0x38] sm:$0xff] %vm321_vm2, %v318_v4 }
  0x88   : > { %322 = vst.msk [vmem:[#allocation2] sm:$0xff] %vm321_vm2, %v316_v6  ;;  %v3325_v8 = vpack.c.bf16 %v385_v7, %v384_v5  ;;  %v371_v17 = vld [vmem:[#allocation2 + $0x8] sm:$0xff]  ;;  %v341_v5 = vld [vmem:[%s4174_s2 + $0x18] sm:$0xff]  ;;  %v3104_v6 = vld [vmem:[%s4173_s1 + $0x10] sm:$0xff] }
  0x89   : > { %330 = vst.msk [vmem:[#allocation2 + $0x40] sm:$0xff] %vm321_vm2, %v318_v4  ;;  %v372_v27 = vld [vmem:[#allocation2 + $0x10] sm:$0xff]  ;;  %v3115_v7 = vld [vmem:[%s4173_s1 + $0x68] sm:$0xff] }
  0x8a   : > { %497 = vrot.lane.b32.xlu1 %v3325_v8, %s3224_s8  ;;  %331 = vst.msk [vmem:[#allocation2 + $0x48] sm:$0xff] %vm321_vm2, %v318_v4  ;;  %v373_v28 = vld [vmem:[#allocation2 + $0x18] sm:$0xff] }
  0x8b   : > { %332 = vst.msk [vmem:[#allocation2 + $0x50] sm:$0xff] %vm321_vm2, %v318_v4  ;;  %v374_v23 = vld [vmem:[#allocation2 + $0x20] sm:$0xff]  ;;  %v3361_v29 = vpack.c.bf16 %v373_v28, %v372_v27 }
  0x8c   : > { %333 = vst.msk [vmem:[#allocation2 + $0x58] sm:$0xff] %vm321_vm2, %v318_v4  ;;  %v375_v24 = vld [vmem:[#allocation2 + $0x28] sm:$0xff] }
  0x8d   : > { %334 = vst.msk [vmem:[#allocation2 + $0x60] sm:$0xff] %vm321_vm2, %v318_v4  ;;  %v376_v9 = vld [vmem:[#allocation2 + $0x30] sm:$0xff]  ;;  %v3355_v26 = vpack.c.bf16 %v375_v24, %v374_v23 }
  0x8e   : > { %335 = vst.msk [vmem:[#allocation2 + $0x68] sm:$0xff] %vm321_vm2, %v318_v4  ;;  %v377_v10 = vld [vmem:[#allocation2 + $0x38] sm:$0xff]  ;;  %v3114_v4 = vld [vmem:[%s4173_s1 + $0x60] sm:$0xff] }
  0x8f   : > { %v3335_v11 = vpack.c.bf16 %v377_v10, %v376_v9  ;;  %v370_v13 = vld [vmem:[#allocation2] sm:$0xff]  ;;  %v3105_v9 = vld [vmem:[%s4173_s1 + $0x18] sm:$0xff]  ;;  %v3116_v10 = vld [vmem:[%s4173_s1 + $0x70] sm:$0xff] }
  0x90   : > { %v3341_v19 = vpack.c.bf16 %v371_v17, %v370_v13  ;;  %v378_v21 = vld [vmem:[#allocation2 + $0x40] sm:$0xff]  ;;  %v3117_v13 = vld [vmem:[%s4173_s1 + $0x78] sm:$0xff] }
  0x91   : > { %489 = vrot.lane.b32.xlu0 %v3335_v11, %s3224_s8  ;;  %v379_v22 = vld [vmem:[#allocation2 + $0x48] sm:$0xff] }
  0x92   : > { %v380_v12 = vld [vmem:[#allocation2 + $0x50] sm:$0xff]  ;;  %v3351_v25 = vpack.c.bf16 %v379_v22, %v378_v21  ;;  %v3109_v21 = vld [vmem:[%s4173_s1 + $0x38] sm:$0xff] }
  0x93   : > { %v381_v14 = vld [vmem:[#allocation2 + $0x58] sm:$0xff] }
  0x94   : > { %v3339_v15 = vpack.c.bf16 %v381_v14, %v380_v12  ;;  %v382_v16 = vld [vmem:[#allocation2 + $0x60] sm:$0xff]  ;;  %v3107_v14 = vld [vmem:[%s4173_s1 + $0x28] sm:$0xff] }
  0x95   : > { %v383_v18 = vld [vmem:[#allocation2 + $0x68] sm:$0xff]  ;;  %v3106_v12 = vld [vmem:[%s4173_s1 + $0x20] sm:$0xff] }
  0x96   : > { %493 = vrot.lane.b32.xlu2 %v3339_v15, %s3224_s8  ;;  %v3345_v20 = vpack.c.bf16 %v383_v18, %v382_v16  ;;  %v3108_v16 = vld [vmem:[%s4173_s1 + $0x30] sm:$0xff] }
  0x98   : > { %495 = vrot.lane.b32.xlu1 %v3345_v20, %s3224_s8 }
  0x99   : > { %483 = vrot.lane.b32.xlu0 %v3341_v19, %s3224_s8 }
  0x9e   : > { %491 = vrot.lane.b32.xlu2 %v3351_v25, %s3224_s8 }
  0xa0   : > { %487 = vrot.lane.b32.xlu1 %v3355_v26, %s3224_s8 }
  0xa1   : > { %614 = vrot.lane.b32.xlu0 %v3339_v15, %s3225_s9 }
  0xa6   : > { %485 = vrot.lane.b32.xlu2 %v3361_v29, %s3224_s8 }
  0xa8   : > { %618 = vrot.lane.b32.xlu1 %v3325_v8, %s3225_s9 }
  0xa9   : > { %608 = vrot.lane.b32.xlu0 %v3355_v26, %s3225_s9 }
  0xae   : > { %616 = vrot.lane.b32.xlu2 %v3345_v20, %s3225_s9 }
  0xb0   : > { %612 = vrot.lane.b32.xlu1 %v3351_v25, %s3225_s9 }
  0xb1   : > { %749 = vperm.xlu0 %3211, %v352_v36  }
  0xb6   : > { %610 = vrot.lane.b32.xlu2 %v3335_v11, %s3225_s9 }
  0xb8   : > { %606 = vrot.lane.b32.xlu1 %v3361_v29, %s3225_s9 }
  0xb9   : > { %734 = vperm.xlu0 %3211, %v349_v40  }
  0xbe   : > { %604 = vrot.lane.b32.xlu2 %v3341_v19, %s3225_s9 }
  0xc0   : > { %754 = vperm.xlu1 %3212, %v353_v35  }
  0xc1   : > { %709 = vperm.xlu0 %3211, %v344_v45  }
  0xc6   : > { %739 = vperm.xlu2 %3213, %v350_v58  }
  0xc8   : > { %744 = vperm.xlu1 %3212, %v351_v39  }
  0xc9   : > { %704 = vperm.xlu0 %3211, %v343_v50  }
  0xce   : > { %729 = vperm.xlu2 %3213, %v348_v0  }
  0xd0   : > { %719 = vperm.xlu1 %3212, %v346_v44  }
  0xd1   : > { %679 = vperm.xlu0 %3211, %v338_v55  }
  0xd6   : > { %724 = vperm.xlu2 %3213, %v347_v1  }
  0xd8   : > { %714 = vperm.xlu1 %3212, %v345_v49  }
  0xde   : > { %699 = vperm.xlu2 %3213, %v342_v3  }
  0xe0   : > { %689 = vperm.xlu1 %3212, %v340_v54  }
  0xe6   : > { %694 = vperm.xlu2 %3213, %v341_v5  }
  0xe8   : > { %684 = vperm.xlu1 %3212, %v339_v60  }
  0xf0   : > { %v494_v31 = vpop.permute.xlu2 %493 }
  0xf8   : > { %v492_v33 = vpop.permute.xlu2 %491 }
  0xfc   : > { %v498_v30 = vpop.permute.xlu1 %497 }
  0xfd   : > { %507 = vmatpush.bf16.msra.mxu0 %v498_v30  ;;  %3174 = vmatpush.bf16.msra.mxu1 %v498_v30 }
  0xfe   : > { %3175 = vmatpush.bf16.msra.mxu2 %v498_v30  ;;  %3176 = vmatpush.bf16.msra.mxu3 %v498_v30 }
 0x100   : > { %v486_v41 = vpop.permute.xlu2 %485 }
 0x103   : > { %v490_v37 = vpop.permute.xlu0 %489 }
 0x108   : > { %v617_v48 = vpop.permute.xlu2 %616 }
 0x10a   : > { %v496_v32 = vpop.permute.xlu1 %495 }
 0x10b   : > { %508 = vmatpush.bf16.msra.mxu0 %v496_v32  ;;  %3177 = vmatpush.bf16.msra.mxu1 %v496_v32  ;;  %v484_v42 = vpop.permute.xlu0 %483 }
 0x10c   : > { %3178 = vmatpush.bf16.msra.mxu2 %v496_v32  ;;  %3179 = vmatpush.bf16.msra.mxu3 %v496_v32 }
 0x10f   : > { %509 = vmatpush.bf16.msra.mxu0 %v494_v31  ;;  %3180 = vmatpush.bf16.msra.mxu1 %v494_v31 }
 0x110   : > { %3181 = vmatpush.bf16.msra.mxu2 %v494_v31  ;;  %3182 = vmatpush.bf16.msra.mxu3 %v494_v31  ;;  %v611_v57 = vpop.permute.xlu2 %610 }
 0x112   : > { %v488_v38 = vpop.permute.xlu1 %487 }
 0x113   : > { %510 = vmatpush.bf16.msra.mxu0 %v492_v33  ;;  %3183 = vmatpush.bf16.msra.mxu1 %v492_v33  ;;  %v615_v51 = vpop.permute.xlu0 %614 }
 0x114   : > { %3184 = vmatpush.bf16.msra.mxu2 %v492_v33  ;;  %3185 = vmatpush.bf16.msra.mxu3 %v492_v33 }
 0x117   : > { %511 = vmatpush.bf16.msra.mxu0 %v490_v37  ;;  %3186 = vmatpush.bf16.msra.mxu1 %v490_v37 }
 0x118   : > { %3187 = vmatpush.bf16.msra.mxu2 %v490_v37  ;;  %3188 = vmatpush.bf16.msra.mxu3 %v490_v37  ;;  %v605_v62 = vpop.permute.xlu2 %604 }
 0x11a   : > { %v619_v47 = vpop.permute.xlu1 %618 }
 0x11b   : > { %512 = vmatpush.bf16.msra.mxu0 %v488_v38  ;;  %3189 = vmatpush.bf16.msra.mxu1 %v488_v38  ;;  %v609_v59 = vpop.permute.xlu0 %608 }
 0x11c   : > { %3190 = vmatpush.bf16.msra.mxu2 %v488_v38  ;;  %3191 = vmatpush.bf16.msra.mxu3 %v488_v38 }
 0x11f   : > { %513 = vmatpush.bf16.msra.mxu0 %v486_v41  ;;  %3192 = vmatpush.bf16.msra.mxu1 %v486_v41 }
 0x120   : > { %3193 = vmatpush.bf16.msra.mxu2 %v486_v41  ;;  %3194 = vmatpush.bf16.msra.mxu3 %v486_v41 }
 0x122   : > { %v613_v52 = vpop.permute.xlu1 %612 }
 0x123   : > { %514 = vmatpush.bf16.msra.mxu0 %v484_v42  ;;  %3195 = vmatpush.bf16.msra.mxu1 %v484_v42  ;;  %v3487_v31 = vpop.permute.xlu0 %749 }
 0x124   : > { %3196 = vmatpush.bf16.msra.mxu2 %v484_v42  ;;  %3197 = vmatpush.bf16.msra.mxu3 %v484_v42  ;;  %v740_v42 = vpop.permute.xlu2 %739 }
 0x126   : > { %525 = vmatmul.bf16.vlgmr.msra.gmra.mxu1 %v3112_v43  ;;  %515 = vmatmul.bf16.vlgmr.msra.gmra.mxu0 %v3110_v46 }
 0x127   : > { %628 = vmatpush.bf16.msrb.mxu1 %v619_v47  ;;  %535 = vmatmul.bf16.vlgmr.msra.gmra.mxu2 %v3114_v4 }
 0x128   : > { %545 = vmatmul.bf16.vlgmr.msra.gmra.mxu3 %v3116_v10 }
 0x12a   : > { %v607_v61 = vpop.permute.xlu1 %606 }
 0x12b   : > { %629 = vmatpush.bf16.msrb.mxu1 %v617_v48  ;;  %v735_v34 = vpop.permute.xlu0 %734 }
 0x12c   : > { %v730_v47 = vpop.permute.xlu2 %729 }
 0x12f   : > { %630 = vmatpush.bf16.msrb.mxu1 %v615_v51 }
 0x132   : > { %v3491_v36 = vpop.permute.xlu1 %754 }
 0x133   : > { %631 = vmatpush.bf16.msrb.mxu1 %v613_v52  ;;  %v710_v39 = vpop.permute.xlu0 %709 }
 0x136   : > { %530 = vmatmul.bf16.gmra.mxu1 %v3113_v53  ;;  %520 = vmatmul.bf16.gmra.mxu0 %v3111_v56 }
 0x137   : > { %632 = vmatpush.bf16.msrb.mxu1 %v611_v57  ;;  %540 = vmatmul.bf16.gmra.mxu2 %v3115_v7  ;;  %v725_v57 = vpop.permute.xlu2 %724 }
 0x138   : > { %550 = vmatmul.bf16.gmra.mxu3 %v3117_v13 }
 0x13a   : > { %v745_v43 = vpop.permute.xlu1 %744 }
 0x13b   : > { %633 = vmatpush.bf16.msrb.mxu1 %v609_v59 }
 0x13f   : > { %634 = vmatpush.bf16.msrb.mxu1 %v607_v61 }
 0x142   : > { %v720_v50 = vpop.permute.xlu1 %719 }
 0x143   : > { %635 = vmatpush.bf16.msrb.mxu1 %v605_v62 }
 0x146   : > { %636 = vmatmul.bf16.vlgmr.msrb.gmra.mxu1 %v3102_v63 }
 0x156   : > { %641 = vmatmul.bf16.gmra.mxu1 %v3103_v2 }
 0x166   : > { %646 = vmatmul.bf16.gmra.mxu1 %v3104_v6 }
 0x176   : > { %651 = vmatmul.bf16.gmra.mxu1 %v3105_v9 }
 0x186   : > { %656 = vmatmul.bf16.gmra.mxu1 %v3106_v12 }
 0x196   : > { %661 = vmatmul.bf16.gmra.mxu1 %v3107_v14  ;;  %v705_v14 = vpop.permute.xlu0 %704 }
 0x1a3   : > { %v526_v17 = vpop.f32.mrf.mxu1 }
 0x1a6   : > { %666 = vmatmul.bf16.gmra.mxu1 %v3108_v16  ;;  %v516_v16 = vpop.f32.mrf.mxu0 }
 0x1aa   : > { %v536_v46 = vpop.f32.mrf.mxu2 }
 0x1ab   : > { %v3472_v18 = vpop.f32.mrf.mxu1  ;;  %v546_v6 = vpop.f32.mrf.mxu3 }
 0x1b2   : > { %v538_v51 = vpop.f32.mrf.mxu2 }
 0x1b3   : > { %v531_v22 = vpop.f32.mrf.mxu1 }
 0x1b6   : > { %671 = vmatmul.bf16.gmra.mxu1 %v3109_v21 }
 0x1ba   : > { %v541_v59 = vpop.f32.mrf.mxu2 }
 0x1bb   : > { %v3477_v23 = vpop.f32.mrf.mxu1 }
 0x1c2   : > { %v543_v2 = vpop.f32.mrf.mxu2 }
 0x1c3   : > { %v3479_v24 = vpop.f32.mrf.mxu1 }
 0x1cb   : > { %v3481_v27 = vpop.f32.mrf.mxu1 }
 0x1d3   : > { %v3483_v28 = vpop.f32.mrf.mxu1 }
 0x1db   : > { %v3485_v30 = vpop.f32.mrf.mxu1 }
 0x1e3   : > { %v647_v32 = vpop.f32.mrf.mxu1 }
 0x1e4   : > { %v3489_v33 = vadd.f32 %v647_v32, %v526_v17 }
 0x1eb   : > { %v649_v35 = vpop.f32.mrf.mxu1 }
 0x1ec   : > { %v650_v17 = vadd.f32 %v649_v35, %v3472_v18 }
 0x1f3   : > { %v652_v37 = vpop.f32.mrf.mxu1 }
 0x1f4   : > { %v653_v38 = vadd.f32 %v652_v37, %v531_v22  ;;  %v548_v22 = vpop.f32.mrf.mxu3  ;;  %v762_v37 = vadd.f32 %v705_v14, %v650_v17 }
 0x1f6   : > { %v763_v40 = vadd.f32 %v710_v39, %v653_v38  ;;  %vm778_vm9 = vcmp.ge.f32.partialorder %v762_v37, 0.0 }
 0x1f8   : > { %vm779_vm3 = vcmp.ge.f32.partialorder %v763_v40, 0.0  ;;  %v795_v41 = vmul.f32 0.01, %v763_v40 }
 0x1fa   : > { %v811_v44 = vsel %vm779_vm3, %v763_v40, %v795_v41  ;;  %v638_v40 = vadd.f32 %v3479_v24, %v516_v16 }
 0x1fb   : > { %v3493_v45 = vpop.f32.mrf.mxu1  ;;  %849 = vrot.lane.b32.xlu1 %v811_v44, %s3223_s26  ;;  %v794_v44 = vmul.f32 0.01, %v762_v37 }
 0x1fc   : > { %v551_v18 = vpop.f32.mrf.mxu3  ;;  %v655_v24 = vadd.f32 %v3493_v45, %v3477_v23 }
 0x203   : > { %v657_v48 = vpop.f32.mrf.mxu1 }
 0x204   : > { %v658_v49 = vadd.f32 %v657_v48, %v536_v46  ;;  %v680_v46 = vpop.permute.xlu0 %679 }
 0x205   : > { %v757_v35 = vadd.f32 %v680_v46, %v638_v40 }
 0x206   : > { %v765_v52 = vadd.f32 %v720_v50, %v658_v49  ;;  %v810_v49 = vsel %vm778_vm9, %v762_v37, %v794_v44  ;;  %v715_v50 = vpop.permute.xlu1 %714 }
 0x207   : > { %vm773_vm11 = vcmp.ge.f32.partialorder %v757_v35, 0.0 }
 0x208   : > { %vm781_vm4 = vcmp.ge.f32.partialorder %v765_v52, 0.0  ;;  %v797_v53 = vmul.f32 0.01, %v765_v52 }
 0x20a   : > { %v813_v54 = vsel %vm781_vm4, %v765_v52, %v797_v53  ;;  %v789_v53 = vmul.f32 0.01, %v757_v35 }
 0x20b   : > { %v659_v55 = vpop.f32.mrf.mxu1  ;;  %853 = vrot.lane.b32.xlu2 %v813_v54, %s3223_s26 }
 0x20c   : > { %v660_v56 = vadd.f32 %v659_v55, %v538_v51 }
 0x20e   : > { %v766_v58 = vadd.f32 %v725_v57, %v660_v56  ;;  %v764_v56 = vadd.f32 %v715_v50, %v655_v24 }
 0x210   : > { %vm782_vm5 = vcmp.ge.f32.partialorder %v766_v58, 0.0  ;;  %v798_v60 = vmul.f32 0.01, %v766_v58  ;;  %v796_v45 = vmul.f32 0.01, %v764_v56  ;;  %vm780_vm13 = vcmp.ge.f32.partialorder %v764_v56, 0.0 }
 0x212   : > { %v814_v61 = vsel %vm782_vm5, %v766_v58, %v798_v60  ;;  %v805_v58 = vsel %vm773_vm11, %v757_v35, %v789_v53 }
 0x213   : > { %v662_v62 = vpop.f32.mrf.mxu1  ;;  %855 = vrot.lane.b32.xlu0 %v814_v61, %s3223_s26 }
 0x214   : > { %v663_v63 = vadd.f32 %v662_v62, %v541_v59  ;;  %v553_v59 = vpop.f32.mrf.mxu3  ;;  %v690_v62 = vpop.permute.xlu1 %689 }
 0x216   : > { %v767_v0 = vadd.f32 %v730_v47, %v663_v63  ;;  %v518_v47 = vpop.f32.mrf.mxu0  ;;  %v700_v63 = vpop.permute.xlu2 %699 }
 0x218   : > { %vm783_vm6 = vcmp.ge.f32.partialorder %v767_v0, 0.0  ;;  %v799_v1 = vmul.f32 0.01, %v767_v0 }
 0x21a   : > { %v815_v3 = vsel %vm783_vm6, %v767_v0, %v799_v1 }
 0x21b   : > { %v664_v4 = vpop.f32.mrf.mxu1  ;;  %857 = vrot.lane.b32.xlu0 %v815_v3, %s3223_s26 }
 0x21c   : > { %v665_v5 = vadd.f32 %v664_v4, %v543_v2  ;;  %v761_v2 = vadd.f32 %v700_v63, %v3489_v33  ;;  %v812_v4 = vsel %vm780_vm13, %v764_v56, %v796_v45 }
 0x21e   : > { %v768_v7 = vadd.f32 %v735_v34, %v665_v5  ;;  %v521_v55 = vpop.f32.mrf.mxu0  ;;  %vm777_vm15 = vcmp.ge.f32.partialorder %v761_v2, 0.0 }
 0x21f   : > { %v643_v23 = vadd.f32 %v3483_v28, %v521_v55 }
 0x220   : > { %vm784_vm7 = vcmp.ge.f32.partialorder %v768_v7, 0.0  ;;  %v800_v9 = vmul.f32 0.01, %v768_v7 }
 0x221   : > { %v759_v1 = vadd.f32 %v690_v62, %v643_v23 }
 0x222   : > { %v816_v10 = vsel %vm784_vm7, %v768_v7, %v800_v9  ;;  %v793_v7 = vmul.f32 0.01, %v761_v2  ;;  %v685_v9 = vpop.permute.xlu1 %684 }
 0x223   : > { %v667_v12 = vpop.f32.mrf.mxu1  ;;  %859 = vrot.lane.b32.xlu1 %v816_v10, %s3223_s26  ;;  %v695_v10 = vpop.permute.xlu2 %694  ;;  %vm775_vm0 = vcmp.ge.f32.partialorder %v759_v1, 0.0 }
 0x224   : > { %v668_v13 = vadd.f32 %v667_v12, %v546_v6  ;;  %v640_v6 = vadd.f32 %v3481_v27, %v518_v47  ;;  %v809_v33 = vsel %vm777_vm15, %v761_v2, %v793_v7  ;;  %v1403_v7 = vld [vmem:[%s4178_s6 + $0x58] sm:$0xff] }
 0x226   : > { %v769_v21 = vadd.f32 %v740_v42, %v668_v13  ;;  %v523_v5 = vpop.f32.mrf.mxu0  ;;  %v758_v12 = vadd.f32 %v685_v9, %v640_v6  ;;  %v365_v6 = vld [vmem:[%s4176_s4 + $0x58] sm:$0xff]  ;;  %v1402_v9 = vld [vmem:[%s4178_s6 + $0x50] sm:$0xff] }
 0x227   : > { %v645_v28 = vadd.f32 %v3485_v30, %v523_v5  ;;  %v364_v5 = vld [vmem:[%s4176_s4 + $0x50] sm:$0xff] }
 0x228   : > { %vm785_vm8 = vcmp.ge.f32.partialorder %v769_v21, 0.0  ;;  %v801_v32 = vmul.f32 0.01, %v769_v21  ;;  %v790_v16 = vmul.f32 0.01, %v758_v12  ;;  %vm774_vm3 = vcmp.ge.f32.partialorder %v758_v12, 0.0 }
 0x229   : > { %v760_v13 = vadd.f32 %v695_v10, %v645_v28  ;;  %v1405_v28 = vld [vmem:[%s4178_s6 + $0x68] sm:$0xff]  ;;  %v1400_v10 = vld [vmem:[%s4178_s6 + $0x40] sm:$0xff] }
 0x22a   : > { %v817_v38 = vsel %vm785_vm8, %v769_v21, %v801_v32  ;;  %v806_v30 = vsel %vm774_vm3, %v758_v12, %v790_v16  ;;  %v1401_v12 = vld [vmem:[%s4178_s6 + $0x48] sm:$0xff]  ;;  %v1398_v16 = vld [vmem:[%s4178_s6 + $0x30] sm:$0xff] }
 0x22b   : > { %v669_v39 = vpop.f32.mrf.mxu1  ;;  %861 = vrot.lane.b32.xlu1 %v817_v38, %s3223_s26  ;;  %v792_v17 = vmul.f32 0.01, %v760_v13  ;;  %vm776_vm1 = vcmp.ge.f32.partialorder %v760_v13, 0.0 }
 0x22c   : > { %v670_v34 = vadd.f32 %v669_v39, %v548_v22 }
 0x22d   : > { %v808_v27 = vsel %vm776_vm1, %v760_v13, %v792_v17  ;;  %v363_v13 = vld [vmem:[%s4176_s4 + $0x48] sm:$0xff]  ;;  %v360_v17 = vld [vmem:[%s4176_s4 + $0x30] sm:$0xff] }
 0x22e   : > { %v770_v41 = vadd.f32 %v745_v43, %v670_v34 }
 0x230   : > { %vm786_vm10 = vcmp.ge.f32.partialorder %v770_v41, 0.0  ;;  %v802_v48 = vmul.f32 0.01, %v770_v41 }
 0x232   : > { %v818_v42 = vsel %vm786_vm10, %v770_v41, %v802_v48 }
 0x233   : > { %v672_v51 = vpop.f32.mrf.mxu1  ;;  %863 = vrot.lane.b32.xlu2 %v818_v42, %s3223_s26  ;;  %847 = vrot.lane.b32.xlu1 %v810_v49, %s3223_s26 }
 0x234   : > { %v673_v52 = vadd.f32 %v672_v51, %v551_v18 }
 0x236   : > { %v771_v43 = vadd.f32 %v3487_v31, %v673_v52 }
 0x238   : > { %vm787_vm12 = vcmp.ge.f32.partialorder %v771_v43, 0.0  ;;  %v803_v54 = vmul.f32 0.01, %v771_v43 }
 0x23a   : > { %v819_v57 = vsel %vm787_vm12, %v771_v43, %v803_v54 }
 0x23b   : > { %v674_v60 = vpop.f32.mrf.mxu1  ;;  %865 = vrot.lane.b32.xlu2 %v819_v57, %s3223_s26  ;;  %837 = vrot.lane.b32.xlu1 %v805_v58, %s3223_s26 }
 0x23c   : > { %v675_v61 = vadd.f32 %v674_v60, %v553_v59 }
 0x23e   : > { %v772_v31 = vadd.f32 %v3491_v36, %v675_v61  ;;  %v791_v36 = vmul.f32 0.01, %v759_v1 }
 0x240   : > { %vm788_vm14 = vcmp.ge.f32.partialorder %v772_v31, 0.0  ;;  %v804_v0 = vmul.f32 0.01, %v772_v31  ;;  %v807_v14 = vsel %vm775_vm0, %v759_v1, %v791_v36  ;;  %v362_v36 = vld [vmem:[%s4176_s4 + $0x40] sm:$0xff] }
 0x242   : > { %v820_v3 = vsel %vm788_vm14, %v772_v31, %v804_v0 }
 0x243   : > { %867 = vrot.lane.b32.xlu0 %v820_v3, %s3223_s26  ;;  %851 = vrot.lane.b32.xlu2 %v812_v4, %s3223_s26  ;;  %v366_v4 = vld [vmem:[%s4176_s4 + $0x60] sm:$0xff] }
 0x24b   : > { %845 = vrot.lane.b32.xlu0 %v809_v33, %s3223_s26  ;;  %841 = vrot.lane.b32.xlu2 %v807_v14, %s3223_s26  ;;  %v361_v33 = vld [vmem:[%s4176_s4 + $0x38] sm:$0xff] }
 0x253   : > { %843 = vrot.lane.b32.xlu0 %v808_v27, %s3223_s26  ;;  %839 = vrot.lane.b32.xlu2 %v806_v30, %s3223_s26  ;;  %v358_v27 = vld [vmem:[%s4176_s4 + $0x20] sm:$0xff] }
 0x25b   : > { %1558 = vrot.lane.b32.xlu0 %v3325_v8, %s3224_s8 }
 0x263   : > { %1556 = vrot.lane.b32.xlu0 %v3345_v20, %s3224_s8 }
 0x265   : > { %v854_v21 = vpop.permute.xlu2 %853 }
 0x266   : > { %893 = vst.msk [vmem:[#allocation3 + $0x40] sm:$0xff] %vm321_vm2, %v854_v21  ;;  %v359_v21 = vld [vmem:[%s4176_s4 + $0x28] sm:$0xff] }
 0x26d   : > { %v850_v22 = vpop.permute.xlu1 %849  ;;  %v909_v39 = vld [vmem:[#allocation3 + $0x40] sm:$0xff] }
 0x26e   : > { %891 = vst.msk [vmem:[#allocation3 + $0x30] sm:$0xff] %vm321_vm2, %v850_v22  ;;  %v1399_v22 = vld [vmem:[%s4178_s6 + $0x38] sm:$0xff] }
 0x275   : > { %v907_v24 = vld [vmem:[#allocation3 + $0x30] sm:$0xff] }
 0x285   : > { %v856_v32 = vpop.permute.xlu0 %855 }
 0x286   : > { %894 = vst.msk [vmem:[#allocation3 + $0x48] sm:$0xff] %vm321_vm2, %v856_v32  ;;  %v1397_v32 = vld [vmem:[%s4178_s6 + $0x28] sm:$0xff] }
 0x28d   : > { %v864_v37 = vpop.permute.xlu2 %863  ;;  %v858_v38 = vpop.permute.xlu0 %857  ;;  %v910_v34 = vld [vmem:[#allocation3 + $0x48] sm:$0xff] }
 0x28e   : > { %898 = vst.msk [vmem:[#allocation3 + $0x68] sm:$0xff] %vm321_vm2, %v864_v37  ;;  %v937_v40 = vpack.c.bf16 %v910_v34, %v909_v39  ;;  %v1396_v39 = vld [vmem:[%s4178_s6 + $0x20] sm:$0xff]  ;;  %v1394_v34 = vld [vmem:[%s4178_s6 + $0x10] sm:$0xff] }
 0x28f   : > { %895 = vst.msk [vmem:[#allocation3 + $0x50] sm:$0xff] %vm321_vm2, %v858_v38  ;;  %v356_v38 = vld [vmem:[%s4176_s4 + $0x10] sm:$0xff] }
 0x290   : > { %1143 = vrot.lane.b32.xlu2 %v937_v40, %s3225_s9  ;;  %1022 = vrot.lane.b32.xlu1 %v937_v40, %s3224_s8 }
 0x295   : > { %v866_v8 = vpop.permute.xlu2 %865  ;;  %v860_v20 = vpop.permute.xlu1 %859  ;;  %v914_v49 = vld [vmem:[#allocation3 + $0x68] sm:$0xff] }
 0x296   : > { %899 = vst.msk [vmem:[#allocation3 + $0x70] sm:$0xff] %vm321_vm2, %v866_v8  ;;  %v911_v46 = vld [vmem:[#allocation3 + $0x50] sm:$0xff] }
 0x297   : > { %896 = vst.msk [vmem:[#allocation3 + $0x58] sm:$0xff] %vm321_vm2, %v860_v20 }
 0x29d   : > { %v852_v41 = vpop.permute.xlu2 %851  ;;  %v862_v44 = vpop.permute.xlu1 %861  ;;  %v915_v56 = vld [vmem:[#allocation3 + $0x70] sm:$0xff] }
 0x29e   : > { %892 = vst.msk [vmem:[#allocation3 + $0x38] sm:$0xff] %vm321_vm2, %v852_v41  ;;  %v912_v47 = vld [vmem:[#allocation3 + $0x58] sm:$0xff] }
 0x29f   : > { %897 = vst.msk [vmem:[#allocation3 + $0x60] sm:$0xff] %vm321_vm2, %v862_v44  ;;  %v938_v48 = vpack.c.bf16 %v912_v47, %v911_v46  ;;  %v1395_v41 = vld [vmem:[%s4178_s6 + $0x18] sm:$0xff]  ;;  %v355_v46 = vld [vmem:[%s4176_s4 + $0x8] sm:$0xff] }
 0x2a0   : > { %v357_v44 = vld [vmem:[%s4176_s4 + $0x18] sm:$0xff] }
 0x2a1   : > { %1145 = vrot.lane.b32.xlu2 %v938_v48, %s3225_s9  ;;  %1024 = vrot.lane.b32.xlu1 %v938_v48, %s3224_s8 }
 0x2a5   : > { %v842_v18 = vpop.permute.xlu2 %841  ;;  %v848_v35 = vpop.permute.xlu1 %847  ;;  %v908_v51 = vld [vmem:[#allocation3 + $0x38] sm:$0xff] }
 0x2a6   : > { %887 = vst.msk [vmem:[#allocation3 + $0x10] sm:$0xff] %vm321_vm2, %v842_v18  ;;  %v913_v42 = vld [vmem:[#allocation3 + $0x60] sm:$0xff]  ;;  %v936_v43 = vpack.c.bf16 %v908_v51, %v907_v24 }
 0x2a7   : > { %890 = vst.msk [vmem:[#allocation3 + $0x28] sm:$0xff] %vm321_vm2, %v848_v35  ;;  %v939_v50 = vpack.c.bf16 %v914_v49, %v913_v42  ;;  %v1392_v35 = vld [vmem:[%s4178_s6] sm:$0xff] }
 0x2a8   : > { %v354_v42 = vld [vmem:[%s4176_s4] sm:$0xff] }
 0x2a9   : > { %1147 = vrot.lane.b32.xlu0 %v939_v50, %s3225_s9  ;;  %1026 = vrot.lane.b32.xlu2 %v939_v50, %s3224_s8 }
 0x2ad   : > { %v840_v52 = vpop.permute.xlu2 %839  ;;  %v838_v53 = vpop.permute.xlu1 %837  ;;  %v903_v23 = vld [vmem:[#allocation3 + $0x10] sm:$0xff] }
 0x2ae   : > { %886 = vst.msk [vmem:[#allocation3 + $0x8] sm:$0xff] %vm321_vm2, %v840_v52  ;;  %v906_v61 = vld [vmem:[#allocation3 + $0x28] sm:$0xff] }
 0x2af   : > { %885 = vst.msk [vmem:[#allocation3] sm:$0xff] %vm321_vm2, %v838_v53  ;;  %v1393_v52 = vld [vmem:[%s4178_s6 + $0x8] sm:$0xff] }
 0x2b1   : > { %1141 = vrot.lane.b32.xlu2 %v936_v43, %s3225_s9 }
 0x2b5   : > { %v868_v54 = vpop.permute.xlu0 %867  ;;  %v902_v1 = vld [vmem:[#allocation3 + $0x8] sm:$0xff] }
 0x2b6   : > { %900 = vst.msk [vmem:[#allocation3 + $0x78] sm:$0xff] %vm321_vm2, %v868_v54  ;;  %v901_v0 = vld [vmem:[#allocation3] sm:$0xff] }
 0x2b7   : > { %v933_v3 = vpack.c.bf16 %v902_v1, %v901_v0  ;;  %v3135_v0 = vld [vmem:[%s4177_s5 + $0x8] sm:$0xff]  ;;  %v3128_v1 = vld [vmem:[%s4175_s3 + $0x50] sm:$0xff] }
 0x2bd   : > { %v846_v55 = vpop.permute.xlu0 %845  ;;  %v916_v57 = vld [vmem:[#allocation3 + $0x78] sm:$0xff] }
 0x2be   : > { %889 = vst.msk [vmem:[#allocation3 + $0x20] sm:$0xff] %vm321_vm2, %v846_v55  ;;  %v940_v58 = vpack.c.bf16 %v916_v57, %v915_v56  ;;  %v3118_v57 = vld [vmem:[%s4175_s3] sm:$0xff] }
 0x2c0   : > { %1149 = vrot.lane.b32.xlu1 %v940_v58, %s3225_s9  ;;  %1028 = vrot.lane.b32.xlu0 %v940_v58, %s3224_s8 }
 0x2c5   : > { %v844_v59 = vpop.permute.xlu0 %843  ;;  %v905_v60 = vld [vmem:[#allocation3 + $0x20] sm:$0xff] }
 0x2c6   : > { %888 = vst.msk [vmem:[#allocation3 + $0x18] sm:$0xff] %vm321_vm2, %v844_v59  ;;  %v935_v62 = vpack.c.bf16 %v906_v61, %v905_v60  ;;  %v3126_v60 = vld [vmem:[%s4175_s3 + $0x40] sm:$0xff] }
 0x2c8   : > { %1020 = vrot.lane.b32.xlu1 %v936_v43, %s3224_s8  ;;  %1554 = vrot.lane.b32.xlu0 %v3339_v15, %s3224_s8  ;;  %v368_v15 = vld [vmem:[%s4176_s4 + $0x70] sm:$0xff] }
 0x2c9   : > { %1139 = vrot.lane.b32.xlu2 %v935_v62, %s3225_s9 }
 0x2cd   : > { %v1559_v63 = vpop.permute.xlu0 %1558  ;;  %v904_v31 = vld [vmem:[#allocation3 + $0x18] sm:$0xff] }
 0x2ce   : > { %1568 = vmatpush.bf16.msrb.mxu0 %v1559_v63  ;;  %v934_v45 = vpack.c.bf16 %v904_v31, %v903_v23  ;;  %v3119_v63 = vld [vmem:[%s4175_s3 + $0x8] sm:$0xff]  ;;  %v3134_v23 = vld [vmem:[%s4177_s5] sm:$0xff] }
 0x2cf   : > { %v3127_v31 = vld [vmem:[%s4175_s3 + $0x48] sm:$0xff] }
 0x2d0   : > { %1552 = vrot.lane.b32.xlu0 %v3351_v25, %s3224_s8  ;;  %1018 = vrot.lane.b32.xlu1 %v935_v62, %s3224_s8  ;;  %v1407_v25 = vld [vmem:[%s4178_s6 + $0x78] sm:$0xff] }
 0x2d1   : > { %1137 = vrot.lane.b32.xlu2 %v934_v45, %s3225_s9 }
 0x2d5   : > { %v1557_v2 = vpop.permute.xlu0 %1556 }
 0x2d6   : > { %1569 = vmatpush.bf16.msrb.mxu0 %v1557_v2 }
 0x2d8   : > { %1550 = vrot.lane.b32.xlu0 %v3335_v11, %s3224_s8  ;;  %1016 = vrot.lane.b32.xlu1 %v934_v45, %s3224_s8  ;;  %v1406_v11 = vld [vmem:[%s4178_s6 + $0x70] sm:$0xff] }
 0x2d9   : > { %1135 = vrot.lane.b32.xlu2 %v933_v3, %s3225_s9  ;;  %v3120_v45 = vld [vmem:[%s4175_s3 + $0x10] sm:$0xff] }
 0x2e0   : > { %1548 = vrot.lane.b32.xlu0 %v3355_v26, %s3224_s8  ;;  %1014 = vrot.lane.b32.xlu1 %v933_v3, %s3224_s8  ;;  %v367_v26 = vld [vmem:[%s4176_s4 + $0x68] sm:$0xff]  ;;  %v3121_v3 = vld [vmem:[%s4175_s3 + $0x18] sm:$0xff] }
 0x2e1   : > { %1544 = vrot.lane.b32.xlu2 %v3341_v19, %s3224_s8  ;;  %v369_v19 = vld [vmem:[%s4176_s4 + $0x78] sm:$0xff] }
 0x2e8   : > { %1280 = vperm.xlu0 %3211, %v368_v15   ;;  %1546 = vrot.lane.b32.xlu1 %v3361_v29, %s3224_s8  ;;  %v1404_v29 = vld [vmem:[%s4178_s6 + $0x60] sm:$0xff]  ;;  %v3136_v15 = vld [vmem:[%s4177_s5 + $0x10] sm:$0xff] }
 0x2e9   : > { %1480 = vperm.xlu2 %3213, %v1406_v11  }
 0x2ea   : > { %v1144_v14 = vpop.permute.xlu2 %1143 }
 0x2f0   : > { %1485 = vperm.xlu0 %3211, %v1407_v25   ;;  %1285 = vperm.xlu1 %3212, %v369_v19   ;;  %v3129_v25 = vld [vmem:[%s4175_s3 + $0x58] sm:$0xff] }
 0x2f1   : > { %1275 = vperm.xlu2 %3213, %v367_v26  }
 0x2f8   : > { %1470 = vperm.xlu0 %3211, %v1404_v29   ;;  %1270 = vperm.xlu1 %3212, %v366_v4   ;;  %v3122_v29 = vld [vmem:[%s4175_s3 + $0x20] sm:$0xff]  ;;  %v3137_v4 = vld [vmem:[%s4177_s5 + $0x18] sm:$0xff] }
 0x2f9   : > { %1260 = vperm.xlu2 %3213, %v364_v5  }
 0x2fb   : > { %v1146_v30 = vpop.permute.xlu2 %1145 }
 0x300   : > { %1265 = vperm.xlu0 %3211, %v365_v6   ;;  %1475 = vperm.xlu1 %3212, %v1405_v28   ;;  %v3130_v6 = vld [vmem:[%s4175_s3 + $0x60] sm:$0xff] }
 0x301   : > { %1465 = vperm.xlu2 %3213, %v1403_v7  }
 0x302   : > { %v1023_v37 = vpop.permute.xlu1 %1022 }
 0x303   : > { %v1027_v40 = vpop.permute.xlu2 %1026 }
 0x308   : > { %1250 = vperm.xlu0 %3211, %v362_v36   ;;  %1460 = vperm.xlu1 %3212, %v1402_v9   ;;  %v3123_v36 = vld [vmem:[%s4175_s3 + $0x28] sm:$0xff]  ;;  %v3138_v9 = vld [vmem:[%s4177_s5 + $0x20] sm:$0xff] }
 0x309   : > { %1450 = vperm.xlu2 %3213, %v1400_v10  }
 0x30b   : > { %v1142_v47 = vpop.permute.xlu2 %1141 }
 0x310   : > { %1455 = vperm.xlu0 %3211, %v1401_v12   ;;  %1255 = vperm.xlu1 %3212, %v363_v13   ;;  %v3131_v13 = vld [vmem:[%s4175_s3 + $0x68] sm:$0xff] }
 0x311   : > { %1245 = vperm.xlu2 %3213, %v361_v33  }
 0x313   : > { %v1025_v8 = vpop.permute.xlu1 %1024 }
 0x318   : > { %1440 = vperm.xlu0 %3211, %v1398_v16   ;;  %1240 = vperm.xlu1 %3212, %v360_v17  }
 0x319   : > { %1230 = vperm.xlu2 %3213, %v358_v27   ;;  %v3124_v27 = vld [vmem:[%s4175_s3 + $0x30] sm:$0xff] }
 0x31b   : > { %v1148_v20 = vpop.permute.xlu0 %1147 }
 0x320   : > { %1235 = vperm.xlu0 %3211, %v359_v21   ;;  %1445 = vperm.xlu1 %3212, %v1399_v22   ;;  %v3132_v21 = vld [vmem:[%s4175_s3 + $0x70] sm:$0xff] }
 0x321   : > { %1435 = vperm.xlu2 %3213, %v1397_v32  }
 0x323   : > { %v1140_v49 = vpop.permute.xlu2 %1139 }
 0x328   : > { %1220 = vperm.xlu0 %3211, %v356_v38   ;;  %1430 = vperm.xlu1 %3212, %v1396_v39  }
 0x329   : > { %1420 = vperm.xlu2 %3213, %v1394_v34   ;;  %v3125_v34 = vld [vmem:[%s4175_s3 + $0x38] sm:$0xff] }
 0x32b   : > { %v1138_v43 = vpop.permute.xlu2 %1137 }
 0x330   : > { %1425 = vperm.xlu0 %3211, %v1395_v41   ;;  %1225 = vperm.xlu1 %3212, %v357_v44  }
 0x331   : > { %1215 = vperm.xlu2 %3213, %v355_v46  }
 0x332   : > { %v1150_v48 = vpop.permute.xlu1 %1149  ;;  %v1029_v18 = vpop.permute.xlu0 %1028 }
 0x333   : > { %1038 = vmatpush.bf16.msrb.mxu2 %v1029_v18  ;;  %1159 = vmatpush.bf16.msrb.mxu3 %v1150_v48  ;;  %v1136_v56 = vpop.permute.xlu2 %1135 }
 0x337   : > { %1039 = vmatpush.bf16.msrb.mxu2 %v1027_v40  ;;  %1160 = vmatpush.bf16.msrb.mxu3 %v1148_v20  ;;  %v3140_v40 = vld [vmem:[%s4177_s5 + $0x30] sm:$0xff]  ;;  %v3133_v20 = vld [vmem:[%s4175_s3 + $0x78] sm:$0xff] }
 0x338   : > { %1410 = vperm.xlu0 %3211, %v1392_v35   ;;  %1210 = vperm.xlu1 %3212, %v354_v42  }
 0x33a   : > { %v1021_v50 = vpop.permute.xlu1 %1020  ;;  %v1555_v51 = vpop.permute.xlu0 %1554 }
 0x33b   : > { %1040 = vmatpush.bf16.msrb.mxu2 %v1025_v8  ;;  %1161 = vmatpush.bf16.msrb.mxu3 %v1146_v30  ;;  %v1545_v62 = vpop.permute.xlu2 %1544  ;;  %v3139_v30 = vld [vmem:[%s4177_s5 + $0x28] sm:$0xff] }
 0x33c   : > { %1570 = vmatpush.bf16.msrb.mxu0 %v1555_v51 }
 0x33f   : > { %1041 = vmatpush.bf16.msrb.mxu2 %v1023_v37  ;;  %1162 = vmatpush.bf16.msrb.mxu3 %v1144_v14 }
 0x340   : > { %1415 = vperm.xlu1 %3212, %v1393_v52  }
 0x342   : > { %v1019_v53 = vpop.permute.xlu1 %1018  ;;  %v1553_v24 = vpop.permute.xlu0 %1552 }
 0x343   : > { %1042 = vmatpush.bf16.msrb.mxu2 %v1021_v50  ;;  %1163 = vmatpush.bf16.msrb.mxu3 %v1142_v47  ;;  %v3727_v10 = vpop.permute.xlu2 %1480  ;;  %v3141_v47 = vld [vmem:[%s4177_s5 + $0x38] sm:$0xff] }
 0x344   : > { %1571 = vmatpush.bf16.msrb.mxu0 %v1553_v24 }
 0x347   : > { %1043 = vmatpush.bf16.msrb.mxu2 %v1019_v53  ;;  %1164 = vmatpush.bf16.msrb.mxu3 %v1140_v49 }
 0x34a   : > { %v1017_v54 = vpop.permute.xlu1 %1016  ;;  %v1551_v55 = vpop.permute.xlu0 %1550 }
 0x34b   : > { %1044 = vmatpush.bf16.msrb.mxu2 %v1017_v54  ;;  %1165 = vmatpush.bf16.msrb.mxu3 %v1138_v43  ;;  %v3736_v14 = vpop.permute.xlu2 %1275 }
 0x34c   : > { %1572 = vmatpush.bf16.msrb.mxu0 %v1551_v55 }
 0x34f   : > { %1166 = vmatpush.bf16.msrb.mxu3 %v1136_v56 }
 0x352   : > { %v1015_v58 = vpop.permute.xlu1 %1014  ;;  %1167 = vmatmul.bf16.vlgmr.msrb.gmra.mxu3 %v3118_v57  ;;  %v1549_v59 = vpop.permute.xlu0 %1548 }
 0x353   : > { %1045 = vmatpush.bf16.msrb.mxu2 %v1015_v58  ;;  %1573 = vmatpush.bf16.msrb.mxu0 %v1549_v59  ;;  %v3751_v22 = vpop.permute.xlu2 %1260 }
 0x356   : > { %1046 = vmatmul.bf16.vlgmr.msrb.gmra.mxu2 %v3126_v60 }
 0x35a   : > { %v1547_v61 = vpop.permute.xlu1 %1546  ;;  %v3689_v2 = vpop.permute.xlu0 %1280 }
 0x35b   : > { %1574 = vmatpush.bf16.msrb.mxu0 %v1547_v61  ;;  %v3757_v38 = vpop.permute.xlu2 %1465 }
 0x35f   : > { %1575 = vmatpush.bf16.msrb.mxu0 %v1545_v62 }
 0x362   : > { %1172 = vmatmul.bf16.gmra.mxu3 %v3119_v63  ;;  %1576 = vmatmul.bf16.vlgmr.msrb.gmra.mxu0 %v3134_v23  ;;  %v3697_v11 = vpop.permute.xlu1 %1285  ;;  %v3702_v19 = vpop.permute.xlu0 %1485 }
 0x363   : > { %v3772_v41 = vpop.permute.xlu2 %1450 }
 0x366   : > { %1051 = vmatmul.bf16.gmra.mxu2 %v3127_v31 }
 0x36a   : > { %v3704_v26 = vpop.permute.xlu1 %1270  ;;  %v3712_v5 = vpop.permute.xlu0 %1470 }
 0x36b   : > { %v3777_v48 = vpop.permute.xlu2 %1245 }
 0x372   : > { %1177 = vmatmul.bf16.gmra.mxu3 %v3120_v45  ;;  %1581 = vmatmul.bf16.gmra.mxu0 %v3135_v0  ;;  %v3717_v28 = vpop.permute.xlu1 %1475  ;;  %v3719_v7 = vpop.permute.xlu0 %1265 }
 0x373   : > { %v1231_v51 = vpop.permute.xlu2 %1230 }
 0x376   : > { %1056 = vmatmul.bf16.gmra.mxu2 %v3128_v1 }
 0x37a   : > { %v3729_v12 = vpop.permute.xlu1 %1460  ;;  %v3734_v33 = vpop.permute.xlu0 %1250 }
 0x37b   : > { %v3789_v60 = vpop.permute.xlu2 %1435 }
 0x382   : > { %1182 = vmatmul.bf16.gmra.mxu3 %v3121_v3  ;;  %1586 = vmatmul.bf16.gmra.mxu0 %v3136_v15  ;;  %v3738_v16 = vpop.permute.xlu1 %1255  ;;  %v3740_v17 = vpop.permute.xlu0 %1455 }
 0x383   : > { %v1421_v1 = vpop.permute.xlu2 %1420 }
 0x386   : > { %1061 = vmatmul.bf16.gmra.mxu2 %v3129_v25 }
 0x38a   : > { %v3753_v32 = vpop.permute.xlu1 %1240  ;;  %v3755_v37 = vpop.permute.xlu0 %1440 }
 0x392   : > { %1187 = vmatmul.bf16.gmra.mxu3 %v3122_v29  ;;  %1591 = vmatmul.bf16.gmra.mxu0 %v3137_v4  ;;  %v3759_v39 = vpop.permute.xlu1 %1445  ;;  %v3767_v8 = vpop.permute.xlu0 %1235 }
 0x396   : > { %1066 = vmatmul.bf16.gmra.mxu2 %v3130_v6 }
 0x39a   : > { %v1431_v44 = vpop.permute.xlu1 %1430  ;;  %v1221_v46 = vpop.permute.xlu0 %1220 }
 0x3a2   : > { %1192 = vmatmul.bf16.gmra.mxu3 %v3123_v36  ;;  %1596 = vmatmul.bf16.gmra.mxu0 %v3138_v9  ;;  %v3779_v18 = vpop.permute.xlu1 %1225  ;;  %v3781_v35 = vpop.permute.xlu0 %1425 }
 0x3a6   : > { %1071 = vmatmul.bf16.gmra.mxu2 %v3131_v13 }
 0x3aa   : > { %v1211_v52 = vpop.permute.xlu1 %1210  ;;  %v1411_v54 = vpop.permute.xlu0 %1410 }
 0x3b2   : > { %1197 = vmatmul.bf16.gmra.mxu3 %v3124_v27  ;;  %1601 = vmatmul.bf16.gmra.mxu0 %v3139_v30 }
 0x3b6   : > { %1076 = vmatmul.bf16.gmra.mxu2 %v3132_v21 }
 0x3c2   : > { %1202 = vmatmul.bf16.gmra.mxu3 %v3125_v34  ;;  %1606 = vmatmul.bf16.gmra.mxu0 %v3140_v40 }
 0x3c6   : > { %1081 = vmatmul.bf16.gmra.mxu2 %v3133_v20 }
 0x3d2   : > { %1611 = vmatmul.bf16.gmra.mxu0 %v3141_v47 }
 0x3d5   : > { %v1168_v42 = vpop.f32.mrf.mxu3 }
 0x3d9   : > { %v1047_v49 = vpop.f32.mrf.mxu2 }
 0x3da   : > { %v1169_v50 = vadd.f32 %v1168_v42, %v1047_v49 }
 0x3dc   : > { %v1288_v53 = vadd.f32 %v1211_v52, %v1169_v50 }
 0x3dd   : > { %v3783_v24 = vpop.f32.mrf.mxu3 }
 0x3de   : > { %v1320_v43 = vmul.f32 0.01, %v1288_v53  ;;  %vm1304_vm4 = vcmp.ge.f32.partialorder %v1288_v53, 0.0 }
 0x3df   : > { %v1577_v55 = vpop.f32.mrf.mxu0 }
 0x3e0   : > { %v1336_v56 = vsel %vm1304_vm4, %v1288_v53, %v1320_v43  ;;  %v1578_v57 = vadd.f32 %v1577_v55, %v1411_v54 }
 0x3e1   : > { %v3785_v58 = vpop.f32.mrf.mxu2 }
 0x3e2   : > { %v3787_v59 = vadd.f32 %v1578_v57, %v1336_v56 }
 0x3e5   : > { %v1173_v61 = vpop.f32.mrf.mxu3 }
 0x3e7   : > { %v3791_v62 = vpop.f32.mrf.mxu0 }
 0x3e9   : > { %v1052_v63 = vpop.f32.mrf.mxu2 }
 0x3ea   : > { %v1174_v23 = vadd.f32 %v1173_v61, %v1052_v63 }
 0x3ec   : > { %v1290_v31 = vadd.f32 %v1221_v46, %v1174_v23 }
 0x3ed   : > { %v3793_v45 = vpop.f32.mrf.mxu3 }
 0x3ee   : > { %v1322_v0 = vmul.f32 0.01, %v1290_v31  ;;  %vm1306_vm5 = vcmp.ge.f32.partialorder %v1290_v31, 0.0 }
 0x3ef   : > { %v1582_v3 = vpop.f32.mrf.mxu0 }
 0x3f0   : > { %v1338_v15 = vsel %vm1306_vm5, %v1290_v31, %v1322_v0  ;;  %v1583_v25 = vadd.f32 %v1582_v3, %v1421_v1 }
 0x3f1   : > { %v3795_v29 = vpop.f32.mrf.mxu2 }
 0x3f2   : > { %v3797_v4 = vadd.f32 %v1583_v25, %v1338_v15 }
 0x3f5   : > { %v1178_v6 = vpop.f32.mrf.mxu3 }
 0x3f7   : > { %v3799_v36 = vpop.f32.mrf.mxu0 }
 0x3f9   : > { %v1057_v9 = vpop.f32.mrf.mxu2 }
 0x3fa   : > { %v1179_v13 = vadd.f32 %v1178_v6, %v1057_v9 }
 0x3fc   : > { %v1292_v27 = vadd.f32 %v1231_v51, %v1179_v13 }
 0x3fd   : > { %v1180_v30 = vpop.f32.mrf.mxu3 }
 0x3fe   : > { %v1324_v21 = vmul.f32 0.01, %v1292_v27  ;;  %vm1308_vm6 = vcmp.ge.f32.partialorder %v1292_v27, 0.0 }
 0x3ff   : > { %v1587_v34 = vpop.f32.mrf.mxu0 }
 0x400   : > { %v1340_v40 = vsel %vm1308_vm6, %v1292_v27, %v1324_v21  ;;  %v1588_v20 = vadd.f32 %v1587_v34, %v1431_v44 }
 0x401   : > { %v1059_v46 = vpop.f32.mrf.mxu2 }
 0x402   : > { %v3801_v47 = vadd.f32 %v1588_v20, %v1340_v40 }
 0x405   : > { %v1183_v42 = vpop.f32.mrf.mxu3 }
 0x407   : > { %v3803_v49 = vpop.f32.mrf.mxu0 }
 0x409   : > { %v1062_v50 = vpop.f32.mrf.mxu2 }
 0x40d   : > { %v3805_v52 = vpop.f32.mrf.mxu3 }
 0x40f   : > { %v1592_v53 = vpop.f32.mrf.mxu0 }
 0x411   : > { %v3807_v43 = vpop.f32.mrf.mxu2 }
 0x415   : > { %v3809_v54 = vpop.f32.mrf.mxu3 }
 0x417   : > { %v3811_v51 = vpop.f32.mrf.mxu0 }
 0x419   : > { %v3813_v55 = vpop.f32.mrf.mxu2 }
 0x41d   : > { %v3815_v56 = vpop.f32.mrf.mxu3 }
 0x41f   : > { %v3817_v44 = vpop.f32.mrf.mxu0 }
 0x421   : > { %v3819_v57 = vpop.f32.mrf.mxu2 }
 0x425   : > { %v1193_v61 = vpop.f32.mrf.mxu3 }
 0x427   : > { %v3821_v63 = vpop.f32.mrf.mxu0 }
 0x429   : > { %v1072_v23 = vpop.f32.mrf.mxu2 }
 0x42a   : > { %v1194_v31 = vadd.f32 %v1193_v61, %v1072_v23  ;;  %v1184_v23 = vadd.f32 %v1183_v42, %v1062_v50 }
 0x42c   : > { %v1298_v0 = vadd.f32 %v3751_v22, %v1194_v31 }
 0x42d   : > { %v1195_v1 = vpop.f32.mrf.mxu3 }
 0x42e   : > { %v1330_v3 = vmul.f32 0.01, %v1298_v0  ;;  %vm1314_vm7 = vcmp.ge.f32.partialorder %v1298_v0, 0.0 }
 0x42f   : > { %v1602_v15 = vpop.f32.mrf.mxu0 }
 0x430   : > { %v1346_v25 = vsel %vm1314_vm7, %v1298_v0, %v1330_v3  ;;  %v1603_v6 = vadd.f32 %v1602_v15, %v3729_v12 }
 0x431   : > { %v1074_v9 = vpop.f32.mrf.mxu2 }
 0x432   : > { %v1627_v13 = vadd.f32 %v1603_v6, %v1346_v25  ;;  %v1196_v27 = vadd.f32 %v1195_v1, %v1074_v9  ;;  %v1294_v1 = vadd.f32 %v3753_v32, %v1184_v23  ;;  %v1181_v6 = vadd.f32 %v1180_v30, %v1059_v46 }
 0x434   : > { %v1299_v21 = vadd.f32 %v3719_v7, %v1196_v27  ;;  %vm1643_vm8 = vcmp.ge.f32.partialorder %v1627_v13, 0.0  ;;  %v1659_v34 = vmul.f32 0.01, %v1627_v13  ;;  %v1326_v50 = vmul.f32 0.01, %v1294_v1 }
 0x435   : > { %v1198_v40 = vpop.f32.mrf.mxu3  ;;  %vm1310_vm12 = vcmp.ge.f32.partialorder %v1294_v1, 0.0 }
 0x436   : > { %v1331_v20 = vmul.f32 0.01, %v1299_v21  ;;  %vm1315_vm9 = vcmp.ge.f32.partialorder %v1299_v21, 0.0  ;;  %v1675_v61 = vsel %vm1643_vm8, %v1627_v13, %v1659_v34  ;;  %v1293_v34 = vadd.f32 %v3767_v8, %v1181_v6 }
 0x437   : > { %v1604_v22 = vpop.f32.mrf.mxu0  ;;  %1717 = vrot.lane.b32.xlu0 %v1675_v61, %s3223_s26  ;;  %v1342_v30 = vsel %vm1310_vm12, %v1294_v1, %v1326_v50  ;;  %v1191_v50 = vadd.f32 %v3815_v56, %v3819_v57  ;;  %vm1633_vm12 = vcmp.ge.f32.partialorder %v3787_v59, 0.0 }
 0x438   : > { %v1347_v31 = vsel %vm1315_vm9, %v1299_v21, %v1331_v20  ;;  %v1605_v0 = vadd.f32 %v1604_v22, %v3757_v38  ;;  %v1325_v23 = vmul.f32 0.01, %v1293_v34  ;;  %vm1309_vm15 = vcmp.ge.f32.partialorder %v1293_v34, 0.0 }
 0x439   : > { %v1077_v3 = vpop.f32.mrf.mxu2 }
 0x43a   : > { %v1628_v12 = vadd.f32 %v1605_v0, %v1347_v31  ;;  %v1199_v15 = vadd.f32 %v1198_v40, %v1077_v3 }
 0x43c   : > { %v1300_v7 = vadd.f32 %v3704_v26, %v1199_v15  ;;  %vm1644_vm10 = vcmp.ge.f32.partialorder %v1628_v12, 0.0  ;;  %v1660_v25 = vmul.f32 0.01, %v1628_v12  ;;  %v1593_v26 = vadd.f32 %v1592_v53, %v3755_v37 }
 0x43d   : > { %v1200_v9 = vpop.f32.mrf.mxu3  ;;  %v1341_v15 = vsel %vm1309_vm15, %v1293_v34, %v1325_v23 }
 0x43e   : > { %v1332_v27 = vmul.f32 0.01, %v1300_v7  ;;  %vm1316_vm11 = vcmp.ge.f32.partialorder %v1300_v7, 0.0  ;;  %v1676_v42 = vsel %vm1644_vm10, %v1628_v12, %v1660_v25  ;;  %v1623_v22 = vadd.f32 %v1593_v26, %v1342_v30 }
 0x43f   : > { %v1607_v13 = vpop.f32.mrf.mxu0  ;;  %1719 = vrot.lane.b32.xlu1 %v1676_v42, %s3223_s26  ;;  %v1297_v26 = vadd.f32 %v3738_v16, %v1191_v50 }
 0x440   : > { %v1348_v38 = vsel %vm1316_vm11, %v1300_v7, %v1332_v27  ;;  %v1608_v21 = vadd.f32 %v1607_v13, %v3712_v5  ;;  %v1189_v5 = vadd.f32 %v3809_v54, %v3813_v55  ;;  %v1655_v25 = vmul.f32 0.01, %v1623_v22 }
 0x441   : > { %v1079_v32 = vpop.f32.mrf.mxu2  ;;  %vm1639_vm0 = vcmp.ge.f32.partialorder %v1623_v22, 0.0  ;;  %vm1313_vm9 = vcmp.ge.f32.partialorder %v1297_v26, 0.0 }
 0x442   : > { %v1629_v40 = vadd.f32 %v1608_v21, %v1348_v38  ;;  %v1201_v20 = vadd.f32 %v1200_v9, %v1079_v32  ;;  %v1296_v6 = vadd.f32 %v3734_v33, %v1189_v5  ;;  %v1598_v32 = vadd.f32 %v3817_v44, %v3772_v41 }
 0x443   : > { %v1600_v44 = vadd.f32 %v3821_v63, %v3740_v17  ;;  %v1176_v17 = vadd.f32 %v3793_v45, %v3795_v29  ;;  %v1216_v63 = vpop.permute.xlu2 %1215 }
 0x444   : > { %v1301_v46 = vadd.f32 %v3736_v14, %v1201_v20  ;;  %vm1645_vm13 = vcmp.ge.f32.partialorder %v1629_v40, 0.0  ;;  %v1661_v61 = vmul.f32 0.01, %v1629_v40  ;;  %v1590_v14 = vadd.f32 %v3803_v49, %v3789_v60 }
 0x445   : > { %v1203_v8 = vpop.f32.mrf.mxu3  ;;  %v1186_v60 = vadd.f32 %v3805_v52, %v3807_v43  ;;  %v1328_v49 = vmul.f32 0.01, %v1296_v6  ;;  %vm1312_vm4 = vcmp.ge.f32.partialorder %v1296_v6, 0.0 }
 0x446   : > { %v1333_v31 = vmul.f32 0.01, %v1301_v46  ;;  %vm1317_vm14 = vcmp.ge.f32.partialorder %v1301_v46, 0.0  ;;  %v1677_v0 = vsel %vm1645_vm13, %v1629_v40, %v1661_v61  ;;  %v1622_v9 = vadd.f32 %v1590_v14, %v1341_v15 }
 0x447   : > { %v1609_v3 = vpop.f32.mrf.mxu0  ;;  %1721 = vrot.lane.b32.xlu1 %v1677_v0, %s3223_s26  ;;  %v1295_v56 = vadd.f32 %v3777_v48, %v1186_v60  ;;  %v1344_v57 = vsel %vm1312_vm4, %v1296_v6, %v1328_v49 }
 0x448   : > { %v1349_v37 = vsel %vm1317_vm14, %v1301_v46, %v1333_v31  ;;  %v1610_v53 = vadd.f32 %v1609_v3, %v3717_v28  ;;  %v1671_v28 = vsel %vm1639_vm0, %v1623_v22, %v1655_v25  ;;  %v1654_v34 = vmul.f32 0.01, %v1622_v9 }
 0x449   : > { %v1082_v12 = vpop.f32.mrf.mxu2  ;;  %vm1638_vm5 = vcmp.ge.f32.partialorder %v1622_v9, 0.0  ;;  %v1327_v23 = vmul.f32 0.01, %v1295_v56  ;;  %v1329_v22 = vmul.f32 0.01, %v1297_v26  ;;  %vm1311_vm8 = vcmp.ge.f32.partialorder %v1295_v56, 0.0 }
 0x44a   : > { %v1630_v1 = vadd.f32 %v1610_v53, %v1349_v37  ;;  %v1204_v7 = vadd.f32 %v1203_v8, %v1082_v12  ;;  %v1670_v30 = vsel %vm1638_vm5, %v1622_v9, %v1654_v34  ;;  %v1649_v3 = vmul.f32 0.01, %v3787_v59 }
 0x44b   : > { %v1343_v5 = vsel %vm1311_vm8, %v1295_v56, %v1327_v23  ;;  %v1345_v8 = vsel %vm1313_vm9, %v1297_v26, %v1329_v22  ;;  %v1291_v25 = vadd.f32 %v3779_v18, %v1176_v17  ;;  %v1653_v18 = vmul.f32 0.01, %v3801_v47 }
 0x44c   : > { %v1302_v54 = vadd.f32 %v3689_v2, %v1204_v7  ;;  %vm1646_vm1 = vcmp.ge.f32.partialorder %v1630_v1, 0.0  ;;  %v1662_v55 = vmul.f32 0.01, %v1630_v1  ;;  %v1626_v14 = vadd.f32 %v1600_v44, %v1345_v8 }
 0x44d   : > { %v1205_v38 = vpop.f32.mrf.mxu3  ;;  %v1323_v45 = vmul.f32 0.01, %v1291_v25  ;;  %vm1307_vm0 = vcmp.ge.f32.partialorder %v1291_v25, 0.0 }
 0x44e   : > { %v1334_v27 = vmul.f32 0.01, %v1302_v54  ;;  %vm1318_vm3 = vcmp.ge.f32.partialorder %v1302_v54, 0.0  ;;  %v1678_v42 = vsel %vm1646_vm1, %v1630_v1, %v1662_v55  ;;  %v1658_v1 = vmul.f32 0.01, %v1626_v14 }
 0x44f   : > { %v1612_v13 = vpop.f32.mrf.mxu0  ;;  %1723 = vrot.lane.b32.xlu2 %v1678_v42, %s3223_s26  ;;  %1709 = vrot.lane.b32.xlu1 %v1671_v28, %s3223_s26  ;;  %vm1642_vm14 = vcmp.ge.f32.partialorder %v1626_v14, 0.0  ;;  %v1651_v55 = vmul.f32 0.01, %v3797_v4  ;;  %vm1637_vm1 = vcmp.ge.f32.partialorder %v3801_v47, 0.0 }
 0x450   : > { %v1350_v2 = vsel %vm1318_vm3, %v1302_v54, %v1334_v27  ;;  %v1613_v33 = vadd.f32 %v1612_v13, %v3727_v10  ;;  %v1625_v10 = vadd.f32 %v1598_v32, %v1344_v57  ;;  %v1585_v54 = vadd.f32 %v3799_v36, %v3781_v35 }
 0x451   : > { %v1084_v21 = vpop.f32.mrf.mxu2  ;;  %v1339_v27 = vsel %vm1307_vm0, %v1291_v25, %v1323_v45  ;;  %vm1635_vm3 = vcmp.ge.f32.partialorder %v3797_v4, 0.0  ;;  %v1669_v60 = vsel %vm1637_vm1, %v3801_v47, %v1653_v18  ;;  %v2900_v25 = vld [vmem:[%s4174_s2 + $0xe8] sm:$0xff]  ;;  %v2897_v45 = vld [vmem:[%s4174_s2 + $0xd0] sm:$0xff] }
 0x452   : > { %v1631_v52 = vadd.f32 %v1613_v33, %v1350_v2  ;;  %v1206_v43 = vadd.f32 %v1205_v38, %v1084_v21  ;;  %v1657_v0 = vmul.f32 0.01, %v1625_v10  ;;  %vm1641_vm10 = vcmp.ge.f32.partialorder %v1625_v10, 0.0  ;;  %v2889_v18 = vld [vmem:[%s4174_s2 + $0x90] sm:$0xff] }
 0x453   : > { %v1620_v28 = vadd.f32 %v1585_v54, %v1339_v27  ;;  %v1667_v49 = vsel %vm1635_vm3, %v3797_v4, %v1651_v55  ;;  %v2896_v54 = vld [vmem:[%s4174_s2 + $0xc8] sm:$0xff]  ;;  %v2891_v55 = vld [vmem:[%s4174_s2 + $0xa0] sm:$0xff]  ;;  %v2890_v27 = vld [vmem:[%s4174_s2 + $0x98] sm:$0xff] }
 0x454   : > { %v1303_v40 = vadd.f32 %v3697_v11, %v1206_v43  ;;  %vm1647_vm6 = vcmp.ge.f32.partialorder %v1631_v52, 0.0  ;;  %v1663_v20 = vmul.f32 0.01, %v1631_v52  ;;  %v1595_v11 = vadd.f32 %v3811_v51, %v3759_v39 }
 0x455   : > { %v1673_v12 = vsel %vm1641_vm10, %v1625_v10, %v1657_v0  ;;  %v1171_v39 = vadd.f32 %v3783_v24, %v3785_v58  ;;  %v1665_v51 = vsel %vm1633_vm12, %v3787_v59, %v1649_v3  ;;  %v1674_v58 = vsel %vm1642_vm14, %v1626_v14, %v1658_v1  ;;  %v1416_v59 = vpop.permute.xlu1 %1415  ;;  %v2893_v1 = vld [vmem:[%s4174_s2 + $0xb0] sm:$0xff] }
 0x456   : > { %v1335_v46 = vmul.f32 0.01, %v1303_v40  ;;  %vm1319_vm7 = vcmp.ge.f32.partialorder %v1303_v40, 0.0  ;;  %v1679_v61 = vsel %vm1647_vm6, %v1631_v52, %v1663_v20  ;;  %v1624_v53 = vadd.f32 %v1595_v11, %v1343_v5 }
 0x457   : > { %v1614_v41 = vpop.f32.mrf.mxu0  ;;  %1725 = vrot.lane.b32.xlu2 %v1679_v61, %s3223_s26  ;;  %1707 = vrot.lane.b32.xlu1 %v1670_v30, %s3223_s26  ;;  %v1289_v7 = vadd.f32 %v1216_v63, %v1171_v39  ;;  %v1580_v29 = vadd.f32 %v3791_v62, %v1416_v59  ;;  %v1652_v62 = vmul.f32 0.01, %v1620_v28  ;;  %vm1636_vm5 = vcmp.ge.f32.partialorder %v1620_v28, 0.0  ;;  %v2898_v39 = vld [vmem:[%s4174_s2 + $0xd8] sm:$0xff]  ;;  %v2887_v59 = vld [vmem:[%s4174_s2 + $0x80] sm:$0xff] }
 0x458   : > { %v1351_v48 = vsel %vm1319_vm7, %v1303_v40, %v1335_v46  ;;  %v1615_v16 = vadd.f32 %v1614_v41, %v3702_v19  ;;  %v1656_v15 = vmul.f32 0.01, %v1624_v53  ;;  %vm1640_vm13 = vcmp.ge.f32.partialorder %v1624_v53, 0.0 }
 0x459   : > { %v1321_v6 = vmul.f32 0.01, %v1289_v7  ;;  %vm1305_vm15 = vcmp.ge.f32.partialorder %v1289_v7, 0.0  ;;  %v1668_v50 = vsel %vm1636_vm5, %v1620_v28, %v1652_v62 }
 0x45a   : > { %v1632_v31 = vadd.f32 %v1615_v16, %v1351_v48  ;;  %v1672_v24 = vsel %vm1640_vm13, %v1624_v53, %v1656_v15 }
 0x45b   : > { %v1337_v9 = vsel %vm1305_vm15, %v1289_v7, %v1321_v6  ;;  %v2895_v6 = vld [vmem:[%s4174_s2 + $0xc0] sm:$0xff] }
 0x45c   : > { %vm1648_vm11 = vcmp.ge.f32.partialorder %v1632_v31, 0.0  ;;  %v1664_v37 = vmul.f32 0.01, %v1632_v31  ;;  %v1618_v42 = vadd.f32 %v1580_v29, %v1337_v9  ;;  %v2894_v29 = vld [vmem:[%s4174_s2 + $0xb8] sm:$0xff]  ;;  %v2888_v9 = vld [vmem:[%s4174_s2 + $0x88] sm:$0xff] }
 0x45e   : > { %v1680_v19 = vsel %vm1648_vm11, %v1632_v31, %v1664_v37  ;;  %v1650_v35 = vmul.f32 0.01, %v1618_v42  ;;  %vm1634_vm4 = vcmp.ge.f32.partialorder %v1618_v42, 0.0  ;;  %v2899_v37 = vld [vmem:[%s4174_s2 + $0xe0] sm:$0xff] }
 0x45f   : > { %1727 = vrot.lane.b32.xlu0 %v1680_v19, %s3223_s26  ;;  %1713 = vrot.lane.b32.xlu2 %v1673_v12, %s3223_s26 }
 0x460   : > { %1697 = vrot.lane.b32.xlu1 %v1665_v51, %s3223_s26  ;;  %v1666_v36 = vsel %vm1634_vm4, %v1618_v42, %v1650_v35  ;;  %v2901_v51 = vld [vmem:[%s4174_s2 + $0xf0] sm:$0xff]  ;;  %v3142_v42 = vld [vmem:[%s4173_s1 + $0x80] sm:$0xff] }
 0x467   : > { %1711 = vrot.lane.b32.xlu2 %v1672_v24, %s3223_s26  ;;  %1715 = vrot.lane.b32.xlu0 %v1674_v58, %s3223_s26  ;;  %v2902_v24 = vld [vmem:[%s4174_s2 + $0xf8] sm:$0xff]  ;;  %v2892_v58 = vld [vmem:[%s4174_s2 + $0xa8] sm:$0xff] }
 0x46f   : > { %1705 = vrot.lane.b32.xlu0 %v1669_v60, %s3223_s26  ;;  %1701 = vrot.lane.b32.xlu2 %v1667_v49, %s3223_s26  ;;  %v3143_v60 = vld [vmem:[%s4173_s1 + $0x88] sm:$0xff] }
 0x477   : > { %1699 = vrot.lane.b32.xlu2 %v1666_v36, %s3223_s26  ;;  %1703 = vrot.lane.b32.xlu0 %v1668_v50, %s3223_s26  ;;  %v3144_v50 = vld [vmem:[%s4173_s1 + $0x90] sm:$0xff] }
 0x4a9   : > { %v1724_v13 = vpop.permute.xlu2 %1723  ;;  %v1718_v2 = vpop.permute.xlu0 %1717 }
 0x4aa   : > { %1758 = vst.msk [vmem:[#allocation2 + $0x68] sm:$0xff] %vm321_vm2, %v1724_v13 }
 0x4ab   : > { %1755 = vst.msk [vmem:[#allocation2 + $0x50] sm:$0xff] %vm321_vm2, %v1718_v2 }
 0x4b1   : > { %v1726_v4 = vpop.permute.xlu2 %1725  ;;  %v1720_v47 = vpop.permute.xlu1 %1719  ;;  %v1796_v57 = vld [vmem:[#allocation2 + $0x68] sm:$0xff] }
 0x4b2   : > { %1759 = vst.msk [vmem:[#allocation2 + $0x70] sm:$0xff] %vm321_vm2, %v1726_v4  ;;  %v1793_v21 = vld [vmem:[#allocation2 + $0x50] sm:$0xff] }
 0x4b3   : > { %1756 = vst.msk [vmem:[#allocation2 + $0x58] sm:$0xff] %vm321_vm2, %v1720_v47  ;;  %v3150_v47 = vld [vmem:[%s4173_s1 + $0xc0] sm:$0xff] }
 0x4b9   : > { %v1722_v33 = vpop.permute.xlu1 %1721  ;;  %v1714_v38 = vpop.permute.xlu2 %1713  ;;  %v1797_v44 = vld [vmem:[#allocation2 + $0x70] sm:$0xff] }
 0x4ba   : > { %1757 = vst.msk [vmem:[#allocation2 + $0x60] sm:$0xff] %vm321_vm2, %v1722_v33  ;;  %v1794_v34 = vld [vmem:[#allocation2 + $0x58] sm:$0xff] }
 0x4bb   : > { %1753 = vst.msk [vmem:[#allocation2 + $0x40] sm:$0xff] %vm321_vm2, %v1714_v38  ;;  %v1821_v32 = vpack.c.bf16 %v1794_v34, %v1793_v21  ;;  %v3145_v33 = vld [vmem:[%s4173_s1 + $0x98] sm:$0xff]  ;;  %v3151_v38 = vld [vmem:[%s4173_s1 + $0xc8] sm:$0xff]  ;;  %v3146_v21 = vld [vmem:[%s4173_s1 + $0xa0] sm:$0xff] }
 0x4bc   : > { %v3152_v34 = vld [vmem:[%s4173_s1 + $0xd0] sm:$0xff] }
 0x4bd   : > { %1907 = vrot.lane.b32.xlu2 %v1821_v32, %s3224_s8 }
 0x4c1   : > { %v1712_v52 = vpop.permute.xlu2 %1711  ;;  %v1710_v43 = vpop.permute.xlu1 %1709  ;;  %v1795_v56 = vld [vmem:[#allocation2 + $0x60] sm:$0xff] }
 0x4c2   : > { %1752 = vst.msk [vmem:[#allocation2 + $0x38] sm:$0xff] %vm321_vm2, %v1712_v52  ;;  %v1822_v26 = vpack.c.bf16 %v1796_v57, %v1795_v56  ;;  %v1791_v8 = vld [vmem:[#allocation2 + $0x40] sm:$0xff]  ;;  %v3153_v52 = vld [vmem:[%s4173_s1 + $0xd8] sm:$0xff] }
 0x4c3   : > { %1751 = vst.msk [vmem:[#allocation2 + $0x30] sm:$0xff] %vm321_vm2, %v1710_v43  ;;  %v3148_v43 = vld [vmem:[%s4173_s1 + $0xb0] sm:$0xff]  ;;  %v3154_v56 = vld [vmem:[%s4173_s1 + $0xe0] sm:$0xff]  ;;  %v3149_v57 = vld [vmem:[%s4173_s1 + $0xb8] sm:$0xff] }
 0x4c4   : > { %1909 = vrot.lane.b32.xlu1 %v1822_v26, %s3224_s8 }
 0x4c9   : > { %v1708_v40 = vpop.permute.xlu1 %1707  ;;  %v1702_v20 = vpop.permute.xlu2 %1701  ;;  %v1790_v30 = vld [vmem:[#allocation2 + $0x38] sm:$0xff] }
 0x4ca   : > { %1750 = vst.msk [vmem:[#allocation2 + $0x28] sm:$0xff] %vm321_vm2, %v1708_v40  ;;  %v1789_v10 = vld [vmem:[#allocation2 + $0x30] sm:$0xff] }
 0x4cb   : > { %1747 = vst.msk [vmem:[#allocation2 + $0x10] sm:$0xff] %vm321_vm2, %v1702_v20  ;;  %v1819_v46 = vpack.c.bf16 %v1790_v30, %v1789_v10  ;;  %v3156_v40 = vld [vmem:[%s4173_s1 + $0xf0] sm:$0xff]  ;;  %v3157_v10 = vld [vmem:[%s4173_s1 + $0xf8] sm:$0xff] }
 0x4cd   : > { %1903 = vrot.lane.b32.xlu1 %v1819_v46, %s3224_s8 }
 0x4d1   : > { %v1700_v61 = vpop.permute.xlu2 %1699  ;;  %v1728_v23 = vpop.permute.xlu0 %1727  ;;  %v1788_v12 = vld [vmem:[#allocation2 + $0x28] sm:$0xff] }
 0x4d2   : > { %1746 = vst.msk [vmem:[#allocation2 + $0x8] sm:$0xff] %vm321_vm2, %v1700_v61  ;;  %v1698_v22 = vpop.permute.xlu1 %1697  ;;  %v3926_v63 = vld [vmem:[#allocation2 + $0x10] sm:$0xff] }
 0x4d3   : > { %1745 = vst.msk [vmem:[#allocation2] sm:$0xff] %vm321_vm2, %v1698_v22 }
 0x4d4   : > { %1760 = vst.msk [vmem:[#allocation2 + $0x78] sm:$0xff] %vm321_vm2, %v1728_v23 }
 0x4d9   : > { %v1716_v41 = vpop.permute.xlu0 %1715  ;;  %v3904_v48 = vld [vmem:[#allocation2 + $0x8] sm:$0xff] }
 0x4da   : > { %1754 = vst.msk [vmem:[#allocation2 + $0x48] sm:$0xff] %vm321_vm2, %v1716_v41  ;;  %v3907_v16 = vld [vmem:[#allocation2] sm:$0xff] }
 0x4db   : > { %v1816_v11 = vpack.c.bf16 %v3904_v48, %v3907_v16  ;;  %v1798_v31 = vld [vmem:[#allocation2 + $0x78] sm:$0xff] }
 0x4dc   : > { %v1823_v0 = vpack.c.bf16 %v1798_v31, %v1797_v44 }
 0x4dd   : > { %1897 = vrot.lane.b32.xlu1 %v1816_v11, %s3224_s8 }
 0x4de   : > { %1911 = vrot.lane.b32.xlu0 %v1823_v0, %s3224_s8  ;;  %2018 = vmatpush.bf16.msra.mxu2 %v1823_v0 }
 0x4e1   : > { %v1706_v5 = vpop.permute.xlu0 %1705  ;;  %v1792_v3 = vld [vmem:[#allocation2 + $0x48] sm:$0xff] }
 0x4e2   : > { %2019 = vmatpush.bf16.msra.mxu2 %v1822_v26  ;;  %1749 = vst.msk [vmem:[#allocation2 + $0x20] sm:$0xff] %vm321_vm2, %v1706_v5  ;;  %v1820_v53 = vpack.c.bf16 %v1792_v3, %v1791_v8  ;;  %v3155_v26 = vld [vmem:[%s4173_s1 + $0xe8] sm:$0xff] }
 0x4e5   : > { %2129 = vperm.xlu1 %3212, %v2899_v37  }
 0x4e6   : > { %2020 = vmatpush.bf16.msra.mxu2 %v1821_v32  ;;  %1905 = vrot.lane.b32.xlu0 %v1820_v53, %s3224_s8  ;;  %v3147_v32 = vld [vmem:[%s4173_s1 + $0xa8] sm:$0xff] }
 0x4e9   : > { %v1704_v14 = vpop.permute.xlu0 %1703  ;;  %v1787_v19 = vld [vmem:[#allocation2 + $0x20] sm:$0xff] }
 0x4ea   : > { %2021 = vmatpush.bf16.msra.mxu2 %v1820_v53  ;;  %1748 = vst.msk [vmem:[#allocation2 + $0x18] sm:$0xff] %vm321_vm2, %v1704_v14  ;;  %v1818_v17 = vpack.c.bf16 %v1788_v12, %v1787_v19 }
 0x4ec   : > { %1901 = vrot.lane.b32.xlu2 %v1818_v17, %s3224_s8 }
 0x4ed   : > { %2124 = vperm.xlu1 %3212, %v2898_v39  }
 0x4ee   : > { %2022 = vmatpush.bf16.msra.mxu2 %v1819_v46 }
 0x4f1   : > { %v3928_v15 = vld [vmem:[#allocation2 + $0x18] sm:$0xff] }
 0x4f2   : > { %2023 = vmatpush.bf16.msra.mxu2 %v1818_v17  ;;  %v1817_v7 = vpack.c.bf16 %v3928_v15, %v3926_v63 }
 0x4f4   : > { %2139 = vperm.xlu2 %3213, %v2901_v51   ;;  %1899 = vrot.lane.b32.xlu0 %v1817_v7, %s3224_s8 }
 0x4f5   : > { %2099 = vperm.xlu1 %3212, %v2893_v1  }
 0x4f6   : > { %2024 = vmatpush.bf16.msra.mxu2 %v1817_v7 }
 0x4fa   : > { %2025 = vmatpush.bf16.msra.mxu2 %v1816_v11 }
 0x4fc   : > { %2134 = vperm.xlu2 %3213, %v2900_v25   ;;  %2144 = vperm.xlu0 %3211, %v2902_v24  }
 0x4fd   : > { %2094 = vperm.xlu1 %3212, %v2892_v58   ;;  %2026 = vmatmul.bf16.vlgmr.msra.gmra.mxu2 %v3142_v42 }
 0x504   : > { %2109 = vperm.xlu2 %3213, %v2895_v6   ;;  %2119 = vperm.xlu0 %3211, %v2897_v45  }
 0x505   : > { %2069 = vperm.xlu1 %3212, %v2887_v59  }
 0x50c   : > { %2104 = vperm.xlu2 %3213, %v2894_v29   ;;  %2114 = vperm.xlu0 %3211, %v2896_v54  }
 0x50d   : > { %2031 = vmatmul.bf16.gmra.mxu2 %v3143_v60 }
 0x514   : > { %2079 = vperm.xlu2 %3213, %v2889_v18   ;;  %2089 = vperm.xlu0 %3211, %v2891_v55  }
 0x517   : > { %v1908_v35 = vpop.permute.xlu2 %1907 }
 0x51c   : > { %2074 = vperm.xlu2 %3213, %v2888_v9   ;;  %2084 = vperm.xlu0 %3211, %v2890_v27  }
 0x51d   : > { %2036 = vmatmul.bf16.gmra.mxu2 %v3144_v50 }
 0x52d   : > { %2041 = vmatmul.bf16.gmra.mxu2 %v3145_v33 }
 0x536   : > { %v1910_v49 = vpop.permute.xlu1 %1909 }
 0x53d   : > { %2046 = vmatmul.bf16.gmra.mxu2 %v3146_v21 }
 0x53f   : > { %v1904_v36 = vpop.permute.xlu1 %1903 }
 0x546   : > { %v1902_v13 = vpop.permute.xlu2 %1901 }
 0x54d   : > { %2051 = vmatmul.bf16.gmra.mxu2 %v3147_v32 }
 0x54f   : > { %v1898_v4 = vpop.permute.xlu1 %1897 }
 0x550   : > { %v1912_v28 = vpop.permute.xlu0 %1911 }
 0x551   : > { %1921 = vmatpush.bf16.msra.mxu1 %v1912_v28 }
 0x555   : > { %1922 = vmatpush.bf16.msra.mxu1 %v1910_v49 }
 0x557   : > { %v2130_v59 = vpop.permute.xlu1 %2129 }
 0x558   : > { %v1906_v62 = vpop.permute.xlu0 %1905 }
 0x559   : > { %1923 = vmatpush.bf16.msra.mxu1 %v1908_v35 }
 0x55d   : > { %1924 = vmatpush.bf16.msra.mxu1 %v1906_v62  ;;  %2056 = vmatmul.bf16.gmra.mxu2 %v3148_v43 }
 0x55f   : > { %v2125_v28 = vpop.permute.xlu1 %2124 }
 0x561   : > { %1925 = vmatpush.bf16.msra.mxu1 %v1904_v36  ;;  %v2140_v36 = vpop.permute.xlu2 %2139 }
 0x565   : > { %1926 = vmatpush.bf16.msra.mxu1 %v1902_v13 }
 0x566   : > { %v1900_v2 = vpop.permute.xlu0 %1899 }
 0x569   : > { %1927 = vmatpush.bf16.msra.mxu1 %v1900_v2  ;;  %v2135_v32 = vpop.permute.xlu2 %2134 }
 0x56d   : > { %1928 = vmatpush.bf16.msra.mxu1 %v1898_v4  ;;  %2061 = vmatmul.bf16.gmra.mxu2 %v3149_v57 }
 0x56e   : > { %v4034_v6 = vpop.permute.xlu0 %2144 }
 0x570   : > { %1929 = vmatmul.bf16.vlgmr.msra.gmra.mxu1 %v3150_v47  ;;  %v2100_v47 = vpop.permute.xlu1 %2099 }
 0x576   : > { %v2120_v55 = vpop.permute.xlu0 %2119 }
 0x580   : > { %1934 = vmatmul.bf16.gmra.mxu1 %v3151_v38  ;;  %v2027_v20 = vpop.f32.mrf.mxu2 }
 0x588   : > { %v2029_v30 = vpop.f32.mrf.mxu2 }
 0x590   : > { %1939 = vmatmul.bf16.gmra.mxu1 %v3152_v34  ;;  %v2032_v46 = vpop.f32.mrf.mxu2 }
 0x598   : > { %v2034_v23 = vpop.f32.mrf.mxu2 }
 0x5a0   : > { %1944 = vmatmul.bf16.gmra.mxu1 %v3153_v52  ;;  %v2037_v44 = vpop.f32.mrf.mxu2 }
 0x5a8   : > { %v2039_v5 = vpop.f32.mrf.mxu2 }
 0x5b0   : > { %1949 = vmatmul.bf16.gmra.mxu1 %v3154_v56  ;;  %v2042_v37 = vpop.f32.mrf.mxu2 }
 0x5b8   : > { %v2044_v12 = vpop.f32.mrf.mxu2 }
 0x5c0   : > { %1954 = vmatmul.bf16.gmra.mxu1 %v3155_v26  ;;  %v2047_v51 = vpop.f32.mrf.mxu2 }
 0x5c8   : > { %v4032_v25 = vpop.f32.mrf.mxu2 }
 0x5d0   : > { %1959 = vmatmul.bf16.gmra.mxu1 %v3156_v40  ;;  %v2052_v58 = vpop.f32.mrf.mxu2 }
 0x5d8   : > { %v2054_v54 = vpop.f32.mrf.mxu2 }
 0x5e0   : > { %1964 = vmatmul.bf16.gmra.mxu1 %v3157_v10  ;;  %v2057_v35 = vpop.f32.mrf.mxu2 }
 0x5e8   : > { %v2059_v21 = vpop.f32.mrf.mxu2 }
 0x5ed   : > { %v1930_v61 = vpop.f32.mrf.mxu1 }
 0x5ee   : > { %v4020_v22 = vadd.f32 %v2027_v20, %v1930_v61  ;;  %v2095_v20 = vpop.permute.xlu1 %2094 }
 0x5f0   : > { %v2062_v10 = vpop.f32.mrf.mxu2 }
 0x5f5   : > { %v1932_v41 = vpop.f32.mrf.mxu1 }
 0x5f6   : > { %v4022_v11 = vadd.f32 %v2029_v30, %v1932_v41  ;;  %v2110_v41 = vpop.permute.xlu2 %2109 }
 0x5fd   : > { %v1935_v31 = vpop.f32.mrf.mxu1 }
 0x5fe   : > { %v4024_v0 = vadd.f32 %v2032_v46, %v1935_v31 }
 0x605   : > { %v1937_v8 = vpop.f32.mrf.mxu1 }
 0x606   : > { %v4026_v3 = vadd.f32 %v2034_v23, %v1937_v8 }
 0x60d   : > { %v1940_v53 = vpop.f32.mrf.mxu1 }
 0x60e   : > { %v4028_v14 = vadd.f32 %v2037_v44, %v1940_v53 }
 0x615   : > { %v1942_v19 = vpop.f32.mrf.mxu1 }
 0x616   : > { %v2040_v39 = vadd.f32 %v2039_v5, %v1942_v19  ;;  %v2070_v19 = vpop.permute.xlu1 %2069 }
 0x618   : > { %v2152_v46 = vadd.f32 %v2095_v20, %v2040_v39 }
 0x61a   : > { %v2184_v5 = vmul.f32 0.01, %v2152_v46  ;;  %vm2168_vm11 = vcmp.ge.f32.partialorder %v2152_v46, 0.0 }
 0x61c   : > { %v2200_v39 = vsel %vm2168_vm11, %v2152_v46, %v2184_v5 }
 0x61d   : > { %v1945_v17 = vpop.f32.mrf.mxu1 }
 0x61e   : > { %v2043_v33 = vadd.f32 %v2042_v37, %v1945_v17 }
 0x620   : > { %v2153_v52 = vadd.f32 %v2100_v47, %v2043_v33 }
 0x622   : > { %v2185_v26 = vmul.f32 0.01, %v2153_v52  ;;  %vm2169_vm9 = vcmp.ge.f32.partialorder %v2153_v52, 0.0 }
 0x624   : > { %v2201_v61 = vsel %vm2169_vm9, %v2153_v52, %v2185_v26 }
 0x625   : > { %v1947_v1 = vpop.f32.mrf.mxu1 }
 0x626   : > { %v4030_v7 = vadd.f32 %v2044_v12, %v1947_v1  ;;  %v2147_v12 = vadd.f32 %v2070_v19, %v4020_v22 }
 0x628   : > { %vm2163_vm13 = vcmp.ge.f32.partialorder %v2147_v12, 0.0 }
 0x62d   : > { %v1950_v24 = vpop.f32.mrf.mxu1 }
 0x62e   : > { %v2048_v8 = vadd.f32 %v2047_v51, %v1950_v24  ;;  %v2179_v51 = vmul.f32 0.01, %v2147_v12 }
 0x630   : > { %v2155_v17 = vadd.f32 %v2110_v41, %v2048_v8 }
 0x632   : > { %v2187_v24 = vmul.f32 0.01, %v2155_v17  ;;  %vm2171_vm14 = vcmp.ge.f32.partialorder %v2155_v17, 0.0 }
 0x635   : > { %v4036_v45 = vpop.f32.mrf.mxu1 }
 0x63d   : > { %v1955_v29 = vpop.f32.mrf.mxu1 }
 0x63e   : > { %v2053_v18 = vadd.f32 %v2052_v58, %v1955_v29  ;;  %v2064_v58 = vpop.f32.mrf.mxu2 }
 0x640   : > { %v2157_v9 = vadd.f32 %v2120_v55, %v2053_v18  ;;  %v2115_v18 = vpop.permute.xlu0 %2114 }
 0x642   : > { %v2189_v27 = vmul.f32 0.01, %v2157_v9  ;;  %vm2173_vm6 = vcmp.ge.f32.partialorder %v2157_v9, 0.0 }
 0x644   : > { %v2205_v42 = vsel %vm2173_vm6, %v2157_v9, %v2189_v27  ;;  %v2050_v9 = vadd.f32 %v4032_v25, %v4036_v45 }
 0x645   : > { %v1957_v60 = vpop.f32.mrf.mxu1  ;;  %2247 = vrot.lane.b32.xlu1 %v2205_v42, %s3223_s26  ;;  %v2195_v42 = vsel %vm2163_vm13, %v2147_v12, %v2179_v51 }
 0x646   : > { %v2055_v49 = vadd.f32 %v2054_v54, %v1957_v60  ;;  %v2105_v54 = vpop.permute.xlu2 %2104 }
 0x647   : > { %v2154_v27 = vadd.f32 %v2105_v54, %v4030_v7 }
 0x648   : > { %v2158_v62 = vadd.f32 %v2125_v28, %v2055_v49  ;;  %v2203_v28 = vsel %vm2171_vm14, %v2155_v17, %v2187_v24  ;;  %v2156_v49 = vadd.f32 %v2115_v18, %v2050_v9  ;;  %v2090_v25 = vpop.permute.xlu0 %2089 }
 0x649   : > { %vm2170_vm0 = vcmp.ge.f32.partialorder %v2154_v27, 0.0  ;;  %v2151_v7 = vadd.f32 %v2090_v25, %v4028_v14  ;;  %v2904_v25 = vld [vmem:[%s4176_s4 + $0x88] sm:$0xff] }
 0x64a   : > { %v2190_v50 = vmul.f32 0.01, %v2158_v62  ;;  %vm2174_vm7 = vcmp.ge.f32.partialorder %v2158_v62, 0.0  ;;  %vm2172_vm1 = vcmp.ge.f32.partialorder %v2156_v49, 0.0 }
 0x64b   : > { %vm2167_vm4 = vcmp.ge.f32.partialorder %v2151_v7, 0.0 }
 0x64c   : > { %v2206_v13 = vsel %vm2174_vm7, %v2158_v62, %v2190_v50  ;;  %v2188_v62 = vmul.f32 0.01, %v2156_v49 }
 0x64d   : > { %2249 = vrot.lane.b32.xlu2 %v2206_v13, %s3223_s26  ;;  %v1960_v2 = vpop.f32.mrf.mxu1 }
 0x64e   : > { %v2058_v4 = vadd.f32 %v2057_v35, %v1960_v2  ;;  %v2080_v35 = vpop.permute.xlu2 %2079  ;;  %v2204_v50 = vsel %vm2172_vm1, %v2156_v49, %v2188_v62  ;;  %v2183_v2 = vmul.f32 0.01, %v2151_v7  ;;  %v2906_v62 = vld [vmem:[%s4176_s4 + $0x98] sm:$0xff] }
 0x64f   : > { %v2149_v45 = vadd.f32 %v2080_v35, %v4024_v0  ;;  %v2905_v35 = vld [vmem:[%s4176_s4 + $0x90] sm:$0xff] }
 0x650   : > { %v2159_v38 = vadd.f32 %v2130_v59, %v2058_v4  ;;  %v2085_v47 = vpop.permute.xlu0 %2084  ;;  %v2199_v0 = vsel %vm2167_vm4, %v2151_v7, %v2183_v2 }
 0x651   : > { %v2181_v13 = vmul.f32 0.01, %v2149_v45  ;;  %vm2165_vm3 = vcmp.ge.f32.partialorder %v2149_v45, 0.0 }
 0x652   : > { %v2191_v34 = vmul.f32 0.01, %v2159_v38  ;;  %vm2175_vm8 = vcmp.ge.f32.partialorder %v2159_v38, 0.0 }
 0x654   : > { %v2207_v43 = vsel %vm2175_vm8, %v2159_v38, %v2191_v34  ;;  %v2197_v38 = vsel %vm2165_vm3, %v2149_v45, %v2181_v13  ;;  %vm2627_vm8 = vcmask 125952  }
 0x655   : > { %2251 = vrot.lane.b32.xlu2 %v2207_v43, %s3223_s26  ;;  %v1962_v56 = vpop.f32.mrf.mxu1 }
 0x656   : > { %v2060_v57 = vadd.f32 %v2059_v21, %v1962_v56  ;;  %v2075_v4 = vpop.permute.xlu2 %2074  ;;  %v2150_v21 = vadd.f32 %v2085_v47, %v4026_v3  ;;  %v3160_v47 = vld [vmem:[%s4175_s3 + $0x90] sm:$0xff] }
 0x657   : > { %v2148_v33 = vadd.f32 %v2075_v4, %v4022_v11  ;;  %v3166_v4 = vld [vmem:[%s4175_s3 + $0xc0] sm:$0xff] }
 0x658   : > { %v2160_v40 = vadd.f32 %v2135_v32, %v2060_v57  ;;  %v2182_v34 = vmul.f32 0.01, %v2150_v21  ;;  %vm2166_vm6 = vcmp.ge.f32.partialorder %v2150_v21, 0.0 }
 0x659   : > { %v2180_v14 = vmul.f32 0.01, %v2148_v33  ;;  %vm2164_vm5 = vcmp.ge.f32.partialorder %v2148_v33, 0.0 }
 0x65a   : > { %vm2176_vm10 = vcmp.ge.f32.partialorder %v2160_v40, 0.0  ;;  %v2192_v30 = vmul.f32 0.01, %v2160_v40  ;;  %v2198_v52 = vsel %vm2166_vm6, %v2150_v21, %v2182_v34  ;;  %v3168_v21 = vld [vmem:[%s4175_s3 + $0xd0] sm:$0xff]  ;;  %v3163_v34 = vld [vmem:[%s4175_s3 + $0xa8] sm:$0xff] }
 0x65b   : > { %v2196_v32 = vsel %vm2164_vm5, %v2148_v33, %v2180_v14  ;;  %v3167_v33 = vld [vmem:[%s4175_s3 + $0xc8] sm:$0xff]  ;;  %v3169_v14 = vld [vmem:[%s4175_s3 + $0xd8] sm:$0xff] }
 0x65c   : > { %v2208_v23 = vsel %vm2176_vm10, %v2160_v40, %v2192_v30 }
 0x65d   : > { %2239 = vrot.lane.b32.xlu2 %v2201_v61, %s3223_s26  ;;  %2253 = vrot.lane.b32.xlu0 %v2208_v23, %s3223_s26  ;;  %v1965_v44 = vpop.f32.mrf.mxu1 }
 0x65e   : > { %v2063_v31 = vadd.f32 %v2062_v10, %v1965_v44 }
 0x660   : > { %v2161_v37 = vadd.f32 %v2140_v36, %v2063_v31 }
 0x662   : > { %v2193_v53 = vmul.f32 0.01, %v2161_v37  ;;  %vm2177_vm12 = vcmp.ge.f32.partialorder %v2161_v37, 0.0 }
 0x664   : > { %v2209_v1 = vsel %vm2177_vm12, %v2161_v37, %v2193_v53 }
 0x665   : > { %2237 = vrot.lane.b32.xlu2 %v2200_v39, %s3223_s26  ;;  %2255 = vrot.lane.b32.xlu0 %v2209_v1, %s3223_s26  ;;  %v1967_v59 = vpop.f32.mrf.mxu1 }
 0x666   : > { %v2065_v29 = vadd.f32 %v2064_v58, %v1967_v59 }
 0x668   : > { %v2162_v55 = vadd.f32 %v4034_v6, %v2065_v29  ;;  %v2186_v6 = vmul.f32 0.01, %v2154_v27 }
 0x66a   : > { %v2194_v22 = vmul.f32 0.01, %v2162_v55  ;;  %vm2178_vm15 = vcmp.ge.f32.partialorder %v2162_v55, 0.0  ;;  %v2202_v36 = vsel %vm2170_vm0, %v2154_v27, %v2186_v6 }
 0x66c   : > { %v2210_v60 = vsel %vm2178_vm15, %v2162_v55, %v2194_v22 }
 0x66d   : > { %2227 = vrot.lane.b32.xlu2 %v2195_v42, %s3223_s26  ;;  %2243 = vrot.lane.b32.xlu0 %v2203_v28, %s3223_s26  ;;  %v2903_v42 = vld [vmem:[%s4176_s4 + $0x80] sm:$0xff] }
 0x66e   : > { %2257 = vrot.lane.b32.xlu1 %v2210_v60, %s3223_s26 }
 0x675   : > { %2241 = vrot.lane.b32.xlu0 %v2202_v36, %s3223_s26  ;;  %v3158_v36 = vld [vmem:[%s4175_s3 + $0x80] sm:$0xff] }
 0x676   : > { %2245 = vrot.lane.b32.xlu1 %v2204_v50, %s3223_s26 }
 0x67d   : > { %2231 = vrot.lane.b32.xlu0 %v2197_v38, %s3223_s26  ;;  %v3161_v38 = vld [vmem:[%s4175_s3 + $0x98] sm:$0xff] }
 0x67e   : > { %2235 = vrot.lane.b32.xlu1 %v2199_v0, %s3223_s26  ;;  %v3162_v0 = vld [vmem:[%s4175_s3 + $0xa0] sm:$0xff] }
 0x685   : > { %2229 = vrot.lane.b32.xlu0 %v2196_v32, %s3223_s26  ;;  %v3170_v32 = vld [vmem:[%s4175_s3 + $0xe0] sm:$0xff] }
 0x686   : > { %2233 = vrot.lane.b32.xlu1 %v2198_v52, %s3223_s26  ;;  %v3164_v52 = vld [vmem:[%s4175_s3 + $0xb0] sm:$0xff] }
 0x6a7   : > { %v2250_v43 = vpop.permute.xlu2 %2249 }
 0x6a8   : > { %2286 = vst.msk [vmem:[#allocation3 + $0x58] sm:$0xff] %vm321_vm2, %v2250_v43  ;;  %v3171_v43 = vld [vmem:[%s4175_s3 + $0xe8] sm:$0xff] }
 0x6af   : > { %v2252_v11 = vpop.permute.xlu2 %2251  ;;  %v2302_v40 = vld [vmem:[#allocation3 + $0x58] sm:$0xff] }
 0x6b0   : > { %2287 = vst.msk [vmem:[#allocation3 + $0x60] sm:$0xff] %vm321_vm2, %v2252_v11  ;;  %v3165_v11 = vld [vmem:[%s4175_s3 + $0xb8] sm:$0xff] }
 0x6b7   : > { %v2240_v3 = vpop.permute.xlu2 %2239  ;;  %v2248_v56 = vpop.permute.xlu1 %2247  ;;  %v2303_v61 = vld [vmem:[#allocation3 + $0x60] sm:$0xff] }
 0x6b8   : > { %2281 = vst.msk [vmem:[#allocation3 + $0x30] sm:$0xff] %vm321_vm2, %v2240_v3  ;;  %v3172_v3 = vld [vmem:[%s4175_s3 + $0xf0] sm:$0xff] }
 0x6b9   : > { %2285 = vst.msk [vmem:[#allocation3 + $0x50] sm:$0xff] %vm321_vm2, %v2248_v56 }
 0x6bf   : > { %v2238_v57 = vpop.permute.xlu2 %2237  ;;  %v2297_v17 = vld [vmem:[#allocation3 + $0x30] sm:$0xff] }
 0x6c0   : > { %2280 = vst.msk [vmem:[#allocation3 + $0x28] sm:$0xff] %vm321_vm2, %v2238_v57  ;;  %v2301_v26 = vld [vmem:[#allocation3 + $0x50] sm:$0xff] }
 0x6c1   : > { %v2329_v20 = vpack.c.bf16 %v2302_v40, %v2301_v26  ;;  %v3173_v26 = vld [vmem:[%s4175_s3 + $0xf8] sm:$0xff] }
 0x6c3   : > { %2415 = vrot.lane.b32.xlu0 %v2329_v20, %s3224_s8 }
 0x6c7   : > { %v2228_v30 = vpop.permute.xlu2 %2227  ;;  %v2296_v55 = vld [vmem:[#allocation3 + $0x28] sm:$0xff] }
 0x6c8   : > { %2275 = vst.msk [vmem:[#allocation3] sm:$0xff] %vm321_vm2, %v2228_v30 }
 0x6cf   : > { %v2254_v10 = vpop.permute.xlu0 %2253  ;;  %v2291_v22 = vld [vmem:[#allocation3] sm:$0xff] }
 0x6d0   : > { %2288 = vst.msk [vmem:[#allocation3 + $0x68] sm:$0xff] %vm321_vm2, %v2254_v10 }
 0x6d7   : > { %v2256_v46 = vpop.permute.xlu0 %2255  ;;  %v2304_v23 = vld [vmem:[#allocation3 + $0x68] sm:$0xff] }
 0x6d8   : > { %2289 = vst.msk [vmem:[#allocation3 + $0x70] sm:$0xff] %vm321_vm2, %v2256_v46  ;;  %v2330_v41 = vpack.c.bf16 %v2304_v23, %v2303_v61 }
 0x6da   : > { %2417 = vrot.lane.b32.xlu2 %v2330_v41, %s3224_s8 }
 0x6df   : > { %v2244_v44 = vpop.permute.xlu0 %2243  ;;  %v2305_v37 = vld [vmem:[#allocation3 + $0x70] sm:$0xff] }
 0x6e0   : > { %v2258_v31 = vpop.permute.xlu1 %2257  ;;  %2283 = vst.msk [vmem:[#allocation3 + $0x40] sm:$0xff] %vm321_vm2, %v2244_v44 }
 0x6e1   : > { %2290 = vst.msk [vmem:[#allocation3 + $0x78] sm:$0xff] %vm321_vm2, %v2258_v31 }
 0x6e7   : > { %v2242_v5 = vpop.permute.xlu0 %2241  ;;  %v2299_v58 = vld [vmem:[#allocation3 + $0x40] sm:$0xff] }
 0x6e8   : > { %v2246_v8 = vpop.permute.xlu1 %2245  ;;  %2282 = vst.msk [vmem:[#allocation3 + $0x38] sm:$0xff] %vm321_vm2, %v2242_v5  ;;  %v2306_v53 = vld [vmem:[#allocation3 + $0x78] sm:$0xff] }
 0x6e9   : > { %2284 = vst.msk [vmem:[#allocation3 + $0x48] sm:$0xff] %vm321_vm2, %v2246_v8  ;;  %v2331_v19 = vpack.c.bf16 %v2306_v53, %v2305_v37 }
 0x6eb   : > { %2419 = vrot.lane.b32.xlu1 %v2331_v19, %s3224_s8  ;;  %2514 = vmatpush.bf16.msra.mxu0 %v2331_v19 }
 0x6ef   : > { %2515 = vmatpush.bf16.msra.mxu0 %v2330_v41  ;;  %v2232_v12 = vpop.permute.xlu0 %2231  ;;  %v2298_v39 = vld [vmem:[#allocation3 + $0x38] sm:$0xff] }
 0x6f0   : > { %v2236_v1 = vpop.permute.xlu1 %2235  ;;  %2277 = vst.msk [vmem:[#allocation3 + $0x10] sm:$0xff] %vm321_vm2, %v2232_v12  ;;  %v2300_v59 = vld [vmem:[#allocation3 + $0x48] sm:$0xff]  ;;  %v2327_v29 = vpack.c.bf16 %v2298_v39, %v2297_v17 }
 0x6f1   : > { %2279 = vst.msk [vmem:[#allocation3 + $0x20] sm:$0xff] %vm321_vm2, %v2236_v1  ;;  %v2328_v54 = vpack.c.bf16 %v2300_v59, %v2299_v58 }
 0x6f2   : > { %2411 = vrot.lane.b32.xlu2 %v2327_v29, %s3224_s8 }
 0x6f3   : > { %2516 = vmatpush.bf16.msra.mxu0 %v2329_v20  ;;  %2413 = vrot.lane.b32.xlu1 %v2328_v54, %s3224_s8 }
 0x6f7   : > { %2517 = vmatpush.bf16.msra.mxu0 %v2328_v54  ;;  %v2230_v18 = vpop.permute.xlu0 %2229  ;;  %v2293_v28 = vld [vmem:[#allocation3 + $0x10] sm:$0xff] }
 0x6f8   : > { %v2234_v51 = vpop.permute.xlu1 %2233  ;;  %2276 = vst.msk [vmem:[#allocation3 + $0x8] sm:$0xff] %vm321_vm2, %v2230_v18  ;;  %v2295_v24 = vld [vmem:[#allocation3 + $0x20] sm:$0xff] }
 0x6f9   : > { %2278 = vst.msk [vmem:[#allocation3 + $0x18] sm:$0xff] %vm321_vm2, %v2234_v51  ;;  %v2326_v9 = vpack.c.bf16 %v2296_v55, %v2295_v24 }
 0x6fb   : > { %2409 = vrot.lane.b32.xlu0 %v2326_v9, %s3224_s8  ;;  %2518 = vmatpush.bf16.msra.mxu0 %v2327_v29 }
 0x6ff   : > { %2519 = vmatpush.bf16.msra.mxu0 %v2326_v9  ;;  %v2292_v27 = vld [vmem:[#allocation3 + $0x8] sm:$0xff] }
 0x700   : > { %v2294_v60 = vld [vmem:[#allocation3 + $0x18] sm:$0xff]  ;;  %v2324_v49 = vpack.c.bf16 %v2292_v27, %v2291_v22 }
 0x701   : > { %v2325_v6 = vpack.c.bf16 %v2294_v60, %v2293_v28 }
 0x702   : > { %2405 = vrot.lane.b32.xlu2 %v2324_v49, %s3224_s8 }
 0x703   : > { %2553 = vperm.xlu0 %3211, %v2903_v42   ;;  %2407 = vrot.lane.b32.xlu1 %v2325_v6, %s3224_s8 }
 0x704   : > { %2520 = vmatpush.bf16.msra.mxu0 %v2325_v6 }
 0x708   : > { %2521 = vmatpush.bf16.msra.mxu0 %v2324_v49 }
 0x70a   : > { %2563 = vperm.xlu2 %3213, %v2905_v35  }
 0x70b   : > { %2568 = vperm.xlu0 %3211, %v2906_v62   ;;  %2558 = vperm.xlu1 %3212, %v2904_v25  }
 0x70c   : > { %2522 = vmatmul.bf16.vlgmr.msra.gmra.mxu0 %v3158_v36 }
 0x712   : > { %2597 = vrot.lane.b32.xlu2 %v3904_v48, %s3224_s8 }
 0x713   : > { %2599 = vrot.lane.b32.xlu0 %v3926_v63, %s3224_s8  ;;  %2595 = vrot.lane.b32.xlu1 %v3907_v16, %s3224_s8  ;;  %v3159_v16 = vld [vmem:[%s4175_s3 + $0x88] sm:$0xff] }
 0x71b   : > { %2601 = vrot.lane.b32.xlu1 %v3928_v15, %s3224_s8 }
 0x71c   : > { %2527 = vmatmul.bf16.gmra.mxu0 %v3159_v16 }
 0x72c   : > { %2532 = vmatmul.bf16.gmra.mxu0 %v3160_v47 }
 0x734   : > { %v2418_v7 = vpop.permute.xlu2 %2417 }
 0x735   : > { %v2416_v50 = vpop.permute.xlu0 %2415 }
 0x73c   : > { %2535 = vmatmul.bf16.gmra.mxu0 %v3161_v38 }
 0x74c   : > { %v2412_v63 = vpop.permute.xlu2 %2411  ;;  %2538 = vmatmul.bf16.gmra.mxu0 %v3162_v0 }
 0x75c   : > { %v2406_v2 = vpop.permute.xlu2 %2405  ;;  %2541 = vmatmul.bf16.gmra.mxu0 %v3163_v34 }
 0x75d   : > { %v2420_v45 = vpop.permute.xlu1 %2419 }
 0x75e   : > { %2429 = vmatpush.bf16.msra.mxu3 %v2420_v45 }
 0x762   : > { %2430 = vmatpush.bf16.msra.mxu3 %v2418_v7 }
 0x764   : > { %v2564_v44 = vpop.permute.xlu2 %2563 }
 0x765   : > { %v2414_v48 = vpop.permute.xlu1 %2413 }
 0x766   : > { %2431 = vmatpush.bf16.msra.mxu3 %v2416_v50 }
 0x76a   : > { %2432 = vmatpush.bf16.msra.mxu3 %v2414_v48 }
 0x76c   : > { %2544 = vmatmul.bf16.gmra.mxu0 %v3164_v52  ;;  %v2598_v18 = vpop.permute.xlu2 %2597 }
 0x76d   : > { %v2410_v15 = vpop.permute.xlu0 %2409 }
 0x76e   : > { %2433 = vmatpush.bf16.msra.mxu3 %v2412_v63 }
 0x772   : > { %2434 = vmatpush.bf16.msra.mxu3 %v2410_v15 }
 0x775   : > { %v2408_v13 = vpop.permute.xlu1 %2407  ;;  %v2554_v23 = vpop.permute.xlu0 %2553 }
 0x776   : > { %2435 = vmatpush.bf16.msra.mxu3 %v2408_v13 }
 0x77a   : > { %2436 = vmatpush.bf16.msra.mxu3 %v2406_v2 }
 0x77c   : > { %2547 = vmatmul.bf16.gmra.mxu0 %v3165_v11 }
 0x77d   : > { %2437 = vmatmul.bf16.vlgmr.msra.gmra.mxu3 %v3166_v4  ;;  %v2559_v30 = vpop.permute.xlu1 %2558  ;;  %v2569_v58 = vpop.permute.xlu0 %2568 }
 0x785   : > { %v2596_v8 = vpop.permute.xlu1 %2595  ;;  %v2600_v6 = vpop.permute.xlu0 %2599 }
 0x789   : > { %v2523_v56 = vpop.f32.mrf.mxu0 }
 0x78d   : > { %2442 = vmatmul.bf16.gmra.mxu3 %v3167_v33  ;;  %v2602_v15 = vpop.permute.xlu1 %2601 }
 0x791   : > { %v2525_v57 = vpop.f32.mrf.mxu0 }
 0x799   : > { %v2528_v40 = vpop.f32.mrf.mxu0 }
 0x79d   : > { %2447 = vmatmul.bf16.gmra.mxu3 %v3168_v21 }
 0x7a1   : > { %v2530_v20 = vpop.f32.mrf.mxu0 }
 0x7a9   : > { %v2533_v10 = vpop.f32.mrf.mxu0 }
 0x7ad   : > { %2450 = vmatmul.bf16.gmra.mxu3 %v3169_v14 }
 0x7b1   : > { %v2534_v5 = vpop.f32.mrf.mxu0 }
 0x7b9   : > { %v2536_v54 = vpop.f32.mrf.mxu0 }
 0x7bd   : > { %2453 = vmatmul.bf16.gmra.mxu3 %v3170_v32 }
 0x7c1   : > { %v2537_v49 = vpop.f32.mrf.mxu0 }
 0x7c9   : > { %v2539_v16 = vpop.f32.mrf.mxu0 }
 0x7cd   : > { %2456 = vmatmul.bf16.gmra.mxu3 %v3171_v43 }
 0x7d1   : > { %v2540_v21 = vpop.f32.mrf.mxu0 }
 0x7d9   : > { %v2542_v14 = vpop.f32.mrf.mxu0 }
 0x7dd   : > { %2459 = vmatmul.bf16.gmra.mxu3 %v3172_v3 }
 0x7e1   : > { %v2543_v32 = vpop.f32.mrf.mxu0 }
 0x7e9   : > { %v2545_v43 = vpop.f32.mrf.mxu0 }
 0x7ed   : > { %2462 = vmatmul.bf16.gmra.mxu3 %v3173_v26 }
 0x7f1   : > { %v2546_v3 = vpop.f32.mrf.mxu0 }
 0x800   : > { %v2438_v46 = vpop.f32.mrf.mxu3 }
 0x801   : > { %v2524_v61 = vadd.f32 %v2523_v56, %v2438_v46 }
 0x803   : > { %v2571_v41 = vadd.f32 %v2554_v23, %v2524_v61 }
 0x805   : > { %vm2575_vm2 = vcmp.ge.f32.partialorder %v2571_v41, 0.0  ;;  %v2579_v31 = vmul.f32 0.01, %v2571_v41 }
 0x807   : > { %v2583_v37 = vsel %vm2575_vm2, %v2571_v41, %v2579_v31 }
 0x808   : > { %v2607_v53 = vadd.f32 %v2596_v8, %v2583_v37  ;;  %v2440_v19 = vpop.f32.mrf.mxu3 }
 0x809   : > { %v2526_v12 = vadd.f32 %v2525_v57, %v2440_v19  ;;  %v2548_v57 = vpop.f32.mrf.mxu0 }
 0x80a   : > { %vm2611_vm7 = vcmp.ge.f32.partialorder %v2607_v53, 0.0  ;;  %v2615_v17 = vmul.f32 0.01, %v2607_v53 }
 0x80b   : > { %v2572_v39 = vadd.f32 %v2559_v30, %v2526_v12 }
 0x80c   : > { %v2619_v1 = vsel %vm2611_vm7, %v2607_v53, %v2615_v17 }
 0x80d   : > { %v2623_v59 = vpack.c.bf16 %v2619_v1, %v2619_v1  ;;  %vm2576_vm9 = vcmp.ge.f32.partialorder %v2572_v39, 0.0  ;;  %v2580_v29 = vmul.f32 0.01, %v2572_v39 }
 0x80f   : > { %2628 = vst.msk [vmem:[%s4159_s27] sm:$0xf] %vm2627_vm8, %v2623_v59  ;;  %v2584_v51 = vsel %vm2576_vm9, %v2572_v39, %v2580_v29 }
 0x810   : > { %v2608_v24 = vadd.f32 %v2598_v18, %v2584_v51  ;;  %v2443_v55 = vpop.f32.mrf.mxu3 }
 0x811   : > { %v2529_v9 = vadd.f32 %v2528_v40, %v2443_v55  ;;  %v2549_v40 = vpop.f32.mrf.mxu0 }
 0x812   : > { %vm2612_vm10 = vcmp.ge.f32.partialorder %v2608_v24, 0.0  ;;  %v2616_v22 = vmul.f32 0.01, %v2608_v24 }
 0x813   : > { %v2573_v27 = vadd.f32 %v2564_v44, %v2529_v9 }
 0x814   : > { %v2620_v42 = vsel %vm2612_vm10, %v2608_v24, %v2616_v22 }
 0x815   : > { %v2624_v28 = vpack.c.bf16 %v2620_v42, %v2620_v42  ;;  %vm2577_vm11 = vcmp.ge.f32.partialorder %v2573_v27, 0.0  ;;  %v2581_v60 = vmul.f32 0.01, %v2573_v27 }
 0x817   : > { %2629 = vst.msk [vmem:[%s4159_s27 + $0x4] sm:$0xf] %vm2627_vm8, %v2624_v28  ;;  %v2585_v35 = vsel %vm2577_vm11, %v2573_v27, %v2581_v60 }
 0x818   : > { %v2609_v62 = vadd.f32 %v2600_v6, %v2585_v35  ;;  %v2445_v25 = vpop.f32.mrf.mxu3 }
 0x819   : > { %v2531_v45 = vadd.f32 %v2530_v20, %v2445_v25 }
 0x81a   : > { %vm2613_vm12 = vcmp.ge.f32.partialorder %v2609_v62, 0.0  ;;  %v2617_v36 = vmul.f32 0.01, %v2609_v62 }
 0x81b   : > { %v2574_v7 = vadd.f32 %v2569_v58, %v2531_v45 }
 0x81c   : > { %v2621_v50 = vsel %vm2613_vm12, %v2609_v62, %v2617_v36 }
 0x81d   : > { %v2625_v48 = vpack.c.bf16 %v2621_v50, %v2621_v50  ;;  %vm2578_vm13 = vcmp.ge.f32.partialorder %v2574_v7, 0.0  ;;  %v2582_v63 = vmul.f32 0.01, %v2574_v7 }
 0x81f   : > { %2630 = vst.msk [vmem:[%s4159_s27 + $0x8] sm:$0xf] %vm2627_vm8, %v2625_v48  ;;  %v2586_v13 = vsel %vm2578_vm13, %v2574_v7, %v2582_v63 }
 0x820   : > { %v2610_v2 = vadd.f32 %v2602_v15, %v2586_v13  ;;  %v2448_v4 = vpop.f32.mrf.mxu3 }
 0x822   : > { %vm2614_vm14 = vcmp.ge.f32.partialorder %v2610_v2, 0.0  ;;  %v2618_v47 = vmul.f32 0.01, %v2610_v2 }
 0x824   : > { %v2622_v33 = vsel %vm2614_vm14, %v2610_v2, %v2618_v47 }
 0x825   : > { %v2626_v38 = vpack.c.bf16 %v2622_v33, %v2622_v33 }
 0x827   : > { %2631 = vst.msk [vmem:[%s4159_s27 + $0xc] sm:$0xf] %vm2627_vm8, %v2626_v38 }
 0x828   : > { %v2449_v0 = vpop.f32.mrf.mxu3 }
 0x830   : > { %v2451_v34 = vpop.f32.mrf.mxu3 }
 0x838   : > { %v2452_v52 = vpop.f32.mrf.mxu3 }
 0x840   : > { %v2454_v11 = vpop.f32.mrf.mxu3 }
 0x848   : > { %v2455_v56 = vpop.f32.mrf.mxu3 }
 0x850   : > { %v2457_v26 = vpop.f32.mrf.mxu3 }
 0x858   : > { %v2458_v20 = vpop.f32.mrf.mxu3 }
 0x860   : > { %v2460_v30 = vpop.f32.mrf.mxu3 }
 0x868   : > { %v2461_v10 = vpop.f32.mrf.mxu3 }
 0x870   : > { %v2463_v46 = vpop.f32.mrf.mxu3 }
 0x878   : > { %v2464_v61 = vpop.f32.mrf.mxu3 }
 0x879 PF: > { %s17_s24 = sadd.s32 1, %s3220_s24  }
 0x87a   : > { %p14_p4 = scmp.ge.s32.totalorder %s17_s24, 4  }
 0x87c   :  { %16 = sbr.rel (!%p14_p4) target bundleno = 1 (0x1), region = 86 }

</bundles_post_ra>
